<compile_context>
chip_gen: v7x
topology: tpu7x:2x2x1
jax: 0.10.0
libtpu: 0.0.40
codegen_flags: <defaults>
</compile_context>

<pallas_src>
import math
import functools

import jax
import jax.numpy as jnp
from jax import lax
from jax.experimental import pallas as pl
from jax.experimental.pallas import tpu as pltpu

EPS = 1e-6


def encoder_block_kernel(
    ln_ref,                 # SMEM (2, 2): [[alpha1, bias1], [alpha2, bias2]]
    x_ref,                  # VMEM (S, D) f32  (batch dim squeezed)
    mbias_ref,              # VMEM (1, S) f32  additive mask bias (0 or -1e9)
    wqkv_ref, bqkv_ref,     # (D, 3D) bf16, (1, 3D) f32   (Q cols pre-scaled by 1/sqrt(d_k))
    wo_ref, bo_ref,         # (D, D)  bf16, (1, D)  f32
    w1_ref, b1_ref,         # (D, F)  bf16, (1, F)  f32
    w2_ref, b2_ref,         # (F, D)  bf16, (1, D)  f32
    o_ref,                  # VMEM (S, D)
    qkv_sc,                 # VMEM scratch (S, 3D) bf16
    ctx_sc,                 # VMEM scratch (S, D)  bf16
    *,
    n_heads: int,
    q_tile: int,
    ff_chunk: int,
):
    f32, bf16 = jnp.float32, jnp.bfloat16

    S, D = x_ref.shape
    d_k = D // n_heads
    F = w1_ref.shape[1]

    x = x_ref[...]                                            # (S, D) f32

    def layer_norm(v, alpha, bias):
        mean = jnp.mean(v, axis=-1, keepdims=True)
        c = v - mean
        # torch.Tensor.std is unbiased (divides by N-1).
        var = jnp.sum(c * c, axis=-1, keepdims=True) * (1.0 / (D - 1))
        # EUP approx reciprocal on the (S, 1) column instead of a full divide.
        inv = pl.reciprocal(jnp.sqrt(var) + EPS, approx=True)
        return (alpha * inv) * c + bias

    # ----- residual connection 0: self-attention over LayerNorm(x) -----
    xn = layer_norm(x, ln_ref[0, 0], ln_ref[0, 1]).astype(bf16)

    # Fused QKV projection: one (S,D)@(D,3D) MXU dot, f32 accumulation,
    # stored bf16 in scratch (it is consumed in bf16 by every later dot).
    qkv_sc[...] = (
        jnp.dot(xn, wqkv_ref[...], preferred_element_type=f32) + bqkv_ref[...]
    ).astype(bf16)

    mbias = mbias_ref[...]                                    # (1, S) f32
    n_qt = S // q_tile

    # Static loop over heads (lane slices are static); pl.loop over query
    # tiles bounds live scores to (Tq, S) and bounds per-tile live ranges.
    for h in range(n_heads):
        q_lo = h * d_k
        kh = qkv_sc[:, D + q_lo:D + q_lo + d_k]               # (S, d_k) bf16
        vh = qkv_sc[:, 2 * D + q_lo:2 * D + q_lo + d_k]       # (S, d_k) bf16

        @pl.loop(0, n_qt)
        def _(qt):
            r = pl.multiple_of(qt * q_tile, q_tile)
            qh = qkv_sc[pl.ds(r, q_tile), q_lo:q_lo + d_k]    # (Tq, d_k) bf16
            # scores = (Q/sqrt(d_k)) @ K^T without materializing a transpose.
            s = lax.dot_general(qh, kh, (((1,), (1,)), ((), ())),
                                preferred_element_type=f32)   # (Tq, S)
            s = s + mbias
            s = s - jnp.max(s, axis=-1, keepdims=True)
            e = jnp.exp(s)
            p = e * pl.reciprocal(jnp.sum(e, axis=-1, keepdims=True), approx=True)
            ctx = jnp.dot(p.astype(bf16), vh,
                          preferred_element_type=f32)         # (Tq, d_k)
            # Write this head's context at its lane offset; the output
            # projection is a single full-K dot after the loop.
            ctx_sc[pl.ds(r, q_tile), q_lo:q_lo + d_k] = ctx.astype(bf16)

    attn = jnp.dot(ctx_sc[...], wo_ref[...],
                   preferred_element_type=f32) + bo_ref[...]  # (S, D)
    x1 = x + attn

    # ----- residual connection 1: feed-forward over LayerNorm(x1) -----
    xn2 = layer_norm(x1, ln_ref[1, 0], ln_ref[1, 1]).astype(bf16)
    ff = jnp.zeros((S, D), f32)
    for f0 in range(0, F, ff_chunk):                          # bounds (S, F) intermediate
        f1 = min(f0 + ff_chunk, F)
        hdn = jnp.dot(xn2, w1_ref[:, f0:f1],
                      preferred_element_type=f32) + b1_ref[:, f0:f1]
        hdn = jnp.maximum(hdn, 0.0).astype(bf16)              # relu
        ff = ff + jnp.dot(hdn, w2_ref[f0:f1, :], preferred_element_type=f32)
    ff = ff + b2_ref[...]

    o_ref[...] = (x1 + ff).astype(o_ref.dtype)


def _vmem_limit_bytes():
    """Generation-aware VMEM budget with headroom for blocks/compiler scratch."""
    cap = 128 * 1024 * 1024
    try:
        cap = getattr(pltpu.get_tpu_info(), "vmem_capacity_bytes", cap)
    except Exception:
        pass
    # Leave ~16 MiB headroom (double-buffered x/o blocks + compiler scratch);
    # cap at 112 MiB on 128 MiB parts, ~48 MiB on v7x's 64 MiB.
    return max(32 * 1024 * 1024, min(cap - 16 * 1024 * 1024, 112 * 1024 * 1024))


def encoder_block(x, mask_bias, kparams, n_heads, *,
                  q_tile=None, ff_chunk=512, out_dtype=jnp.float32):
    """x: (B,S,D) f32.  mask_bias: (B,1,S) additive bias (0 keep / -1e9 masked)."""
    B, S, D = x.shape
    F = kparams["w1"].shape[1]

    if q_tile is None:
        q_tile = S if S <= 256 else 256
    assert S % q_tile == 0, "S must be divisible by the query tile"

    def vmem_full():
        # Whole array resident in VMEM once: no per-step re-DMA / no
        # double-buffering of constant weights.
        return pl.BlockSpec(memory_space=pltpu.MemorySpace.VMEM)

    grid_spec = pltpu.PrefetchScalarGridSpec(
        num_scalar_prefetch=0,
        grid=(B,),
        in_specs=[
            pl.BlockSpec(memory_space=pltpu.MemorySpace.SMEM),          # ln params
            pl.BlockSpec((pl.Squeezed(), S, D), lambda b: (b, 0, 0)),   # x
            pl.BlockSpec((pl.Squeezed(), 1, S), lambda b: (b, 0, 0)),   # mask bias
            vmem_full(), vmem_full(),                                   # wqkv, bqkv
            vmem_full(), vmem_full(),                                   # wo, bo
            vmem_full(), vmem_full(),                                   # w1, b1
            vmem_full(), vmem_full(),                                   # w2, b2
        ],
        out_specs=pl.BlockSpec((pl.Squeezed(), S, D), lambda b: (b, 0, 0)),
        scratch_shapes=[
            pltpu.VMEM((S, 3 * D), jnp.bfloat16),   # fused qkv
            pltpu.VMEM((S, D), jnp.bfloat16),       # per-head contexts (concat layout)
        ],
    )

    # TODO(synk): when B == 1, add a second "parallel" grid axis (query tiles)
    # so both v7x TensorCores get work.
    return pl.pallas_call(
        functools.partial(encoder_block_kernel, n_heads=n_heads,
                          q_tile=q_tile, ff_chunk=ff_chunk),
        out_shape=jax.ShapeDtypeStruct((B, S, D), out_dtype),
        grid_spec=grid_spec,
        compiler_params=pltpu.CompilerParams(
            dimension_semantics=("parallel",),      # batch is embarrassingly parallel
            vmem_limit_bytes=_vmem_limit_bytes(),
        ),
    )(
        kparams["ln"], x, mask_bias,
        kparams["wqkv"], kparams["bqkv"],
        kparams["wo"], kparams["bo"],
        kparams["w1"], kparams["b1"],
        kparams["w2"], kparams["b2"],
    )


def init_params(key, d_model, d_ff):
    """Deterministic init matching nn.Linear shapes (weights pre-transposed to (in, out))."""
    keys = jax.random.split(key, 12)

    def lin(kw, kb, fan_in, fan_out):
        bound = 1.0 / math.sqrt(fan_in)
        w = jax.random.uniform(kw, (fan_in, fan_out), jnp.float32, -bound, bound)
        b = jax.random.uniform(kb, (1, fan_out), jnp.float32, -bound, bound)
        return w, b

    wq, bq = lin(keys[0], keys[1], d_model, d_model)
    wk, bk = lin(keys[2], keys[3], d_model, d_model)
    wv, bv = lin(keys[4], keys[5], d_model, d_model)
    wo, bo = lin(keys[6], keys[7], d_model, d_model)
    w1, b1 = lin(keys[8], keys[9], d_model, d_ff)
    w2, b2 = lin(keys[10], keys[11], d_ff, d_model)
    # LayerNormalization params: alpha=1, bias=0 (per __init__), two instances.
    ln = jnp.array([[1.0, 0.0], [1.0, 0.0]], jnp.float32)
    return dict(wq=wq, bq=bq, wk=wk, bk=bk, wv=wv, bv=bv, wo=wo, bo=bo,
                w1=w1, b1=b1, w2=w2, b2=b2, ln=ln)


def pack_params(p, n_heads):
    """Repack canonical (in,out) f32 params into the kernel's fused bf16 layout.

    1/sqrt(d_k) is folded into the Q columns of wqkv/bqkv so the kernel never
    scales the (S, S) scores on the VPU.
    """
    D = p["wq"].shape[0]
    d_k = D // n_heads
    scale = 1.0 / math.sqrt(d_k)
    bf16 = jnp.bfloat16

    wqkv = jnp.concatenate([p["wq"] * scale, p["wk"], p["wv"]], axis=1).astype(bf16)
    bqkv = jnp.concatenate([p["bq"] * scale, p["bk"], p["bv"]], axis=1)   # f32

    return dict(
        ln=p["ln"],
        wqkv=wqkv, bqkv=bqkv,
        wo=p["wo"].astype(bf16), bo=p["bo"],
        w1=p["w1"].astype(bf16), b1=p["b1"],
        w2=p["w2"].astype(bf16), b2=p["b2"],
    )


def encoder_block_ref(x, mask, params, n_heads, matmul_dtype=jnp.float32):
    """Pure-JAX reference reproducing the PyTorch forward semantics.

    `matmul_dtype=jnp.bfloat16` mirrors the kernel's mixed-precision policy
    (bf16 matmul inputs, f32 accumulation); `jnp.float32` is full precision.
    """
    B, S, D = x.shape
    d_k = D // n_heads
    ln = params["ln"]
    md = matmul_dtype

    def mm(a, w):
        return jnp.dot(a.astype(md), w.astype(md), preferred_element_type=jnp.float32)

    def layer_norm(v, alpha, bias):
        mean = v.mean(-1, keepdims=True)
        std = jnp.sqrt(((v - mean) ** 2).sum(-1, keepdims=True) / (D - 1))
        return alpha * (v - mean) / (std + EPS) + bias

    xn = layer_norm(x, ln[0, 0], ln[0, 1])
    q = mm(xn, params["wq"]) + params["bq"]
    k = mm(xn, params["wk"]) + params["bk"]
    v = mm(xn, params["wv"]) + params["bv"]
    q = q.reshape(B, S, n_heads, d_k).transpose(0, 2, 1, 3)
    k = k.reshape(B, S, n_heads, d_k).transpose(0, 2, 1, 3)
    v = v.reshape(B, S, n_heads, d_k).transpose(0, 2, 1, 3)
    scores = jnp.einsum("bhqd,bhkd->bhqk", q.astype(md), k.astype(md),
                        preferred_element_type=jnp.float32) / math.sqrt(d_k)
    scores = jnp.where(mask[:, None] == 0, -1e9, scores)     # (B,1,S)->(B,1,1,S) broadcast
    p = jax.nn.softmax(scores, axis=-1)
    ctx = jnp.einsum("bhqk,bhkd->bhqd", p.astype(md), v.astype(md),
                     preferred_element_type=jnp.float32)
    ctx = ctx.transpose(0, 2, 1, 3).reshape(B, S, D)
    x1 = x + (mm(ctx, params["wo"]) + params["bo"])
    xn2 = layer_norm(x1, ln[1, 0], ln[1, 1])
    hdn = jnp.maximum(mm(xn2, params["w1"]) + params["b1"], 0.0)
    ff = mm(hdn, params["w2"]) + params["b2"]
    return x1 + ff


if __name__ == "__main__":
    B, S, D, H, F = 2, 8, 32, 4, 64

    key = jax.random.PRNGKey(0)
    kx, kp = jax.random.split(key, 2)
    x = jax.random.normal(kx, (B, S, D), jnp.float32)

    # Key-padding mask (1 = keep, 0 = masked): last 2 key positions of batch 1 masked.
    mask = jnp.ones((B, 1, S), jnp.float32)
    mask = mask.at[1, :, S - 2:].set(0.0)
    # Additive mask bias precomputed on the host (0 keep / -1e9 masked).
    mask_bias = jnp.where(mask == 0.0, -1e9, 0.0).astype(jnp.float32)

    params = init_params(kp, D, F)          # canonical f32 params (reference layout)
    kparams = pack_params(params, H)        # fused bf16 layout for the kernel

    out = jax.block_until_ready(encoder_block(x, mask_bias, kparams, H))
    assert out.shape == (B, S, D)

    # Check against a reference using the same mixed-precision matmul policy.
    ref_bf16 = encoder_block_ref(x, mask, params, H, matmul_dtype=jnp.bfloat16)
    err_bf16 = float(jnp.max(jnp.abs(out - ref_bf16)))
    assert jnp.allclose(out, ref_bf16, atol=2e-2, rtol=2e-2), err_bf16

    # Loose sanity check against the full-f32 reference (gap is bf16 matmul inputs
    # plus EUP approx reciprocals).
    ref_f32 = encoder_block_ref(x, mask, params, H, matmul_dtype=jnp.float32)
    err_f32 = float(jnp.max(jnp.abs(out - ref_f32)))
    assert err_f32 < 0.3, err_f32

    print("KERNEL_OK")
</pallas_src>

<mosaic_0001>
module attributes {stable_mosaic.version = 11 : i64} {
  func.func @encoder_block_kernel(%arg0: i32, %arg1: memref<2x2xf32, #tpu.memory_space<smem>>, %arg2: memref<1x8x32xf32, #tpu.memory_space<vmem>>, %arg3: memref<1x1x8xf32, #tpu.memory_space<vmem>>, %arg4: memref<32x96xbf16, #tpu.memory_space<vmem>>, %arg5: memref<1x96xf32, #tpu.memory_space<vmem>>, %arg6: memref<32x32xbf16, #tpu.memory_space<vmem>>, %arg7: memref<1x32xf32, #tpu.memory_space<vmem>>, %arg8: memref<32x64xbf16, #tpu.memory_space<vmem>>, %arg9: memref<1x64xf32, #tpu.memory_space<vmem>>, %arg10: memref<64x32xbf16, #tpu.memory_space<vmem>>, %arg11: memref<1x32xf32, #tpu.memory_space<vmem>>, %arg12: memref<1x8x32xf32, #tpu.memory_space<vmem>>, %arg13: memref<8x96xbf16, #tpu.memory_space<vmem>>, %arg14: memref<8x32xbf16, #tpu.memory_space<vmem>>) attributes {dimension_semantics = [#tpu.dimension_semantics<parallel>], iteration_bounds = array<i64: 2>, scalar_prefetch = 0 : i64, scratch_operands = 2 : i64, tpu.core_type = #tpu.core_type<tc>, window_params = [{transform_indices = @transform_0, window_bounds = array<i64: 2, 2>}, {transform_indices = @transform_1, window_bounds = array<i64: 1, 8, 32>}, {transform_indices = @transform_2, window_bounds = array<i64: 1, 1, 8>}, {pipeline_mode = #tpu.pipeline_mode<synchronous>, transform_indices = @transform_3, window_bounds = array<i64: 32, 96>}, {pipeline_mode = #tpu.pipeline_mode<synchronous>, transform_indices = @transform_4, window_bounds = array<i64: 1, 96>}, {pipeline_mode = #tpu.pipeline_mode<synchronous>, transform_indices = @transform_5, window_bounds = array<i64: 32, 32>}, {pipeline_mode = #tpu.pipeline_mode<synchronous>, transform_indices = @transform_6, window_bounds = array<i64: 1, 32>}, {pipeline_mode = #tpu.pipeline_mode<synchronous>, transform_indices = @transform_7, window_bounds = array<i64: 32, 64>}, {pipeline_mode = #tpu.pipeline_mode<synchronous>, transform_indices = @transform_8, window_bounds = array<i64: 1, 64>}, {pipeline_mode = #tpu.pipeline_mode<synchronous>, transform_indices = @transform_9, window_bounds = array<i64: 64, 32>}, {pipeline_mode = #tpu.pipeline_mode<synchronous>, transform_indices = @transform_10, window_bounds = array<i64: 1, 32>}, {transform_indices = @transform_11, window_bounds = array<i64: 1, 8, 32>}]} {
    %c0 = arith.constant 0 : index
    %c0_0 = arith.constant 0 : index
    %c0_1 = arith.constant 0 : index
    %0 = vector.load %arg2[%c0, %c0_0, %c0_1] : memref<1x8x32xf32, #tpu.memory_space<vmem>>, vector<1x8x32xf32>
    %1 = vector.shape_cast %0 : vector<1x8x32xf32> to vector<8x32xf32>
    %c0_2 = arith.constant 0 : index
    %c0_3 = arith.constant 0 : index
    %2 = memref.load %arg1[%c0_2, %c0_3] : memref<2x2xf32, #tpu.memory_space<smem>>
    %c0_4 = arith.constant 0 : index
    %c1 = arith.constant 1 : index
    %3 = memref.load %arg1[%c0_4, %c1] : memref<2x2xf32, #tpu.memory_space<smem>>
    %cst = arith.constant dense<0.000000e+00> : vector<8xf32>
    %4 = vector.multi_reduction <add>, %1, %cst [1] : vector<8x32xf32> to vector<8xf32>
    %5 = vector.shape_cast %4 : vector<8xf32> to vector<8x1xf32>
    %cst_5 = arith.constant 3.200000e+01 : f32
    %6 = vector.broadcast %cst_5 : f32 to vector<8x1xf32>
    %7 = arith.divf %5, %6 : vector<8x1xf32>
    %8 = vector.broadcast %7 : vector<8x1xf32> to vector<8x32xf32>
    %9 = arith.subf %1, %8 : vector<8x32xf32>
    %10 = arith.mulf %9, %9 : vector<8x32xf32>
    %cst_6 = arith.constant dense<0.000000e+00> : vector<8xf32>
    %11 = vector.multi_reduction <add>, %10, %cst_6 [1] : vector<8x32xf32> to vector<8xf32>
    %12 = vector.shape_cast %11 : vector<8xf32> to vector<8x1xf32>
    %cst_7 = arith.constant 0.0322580636 : f32
    %13 = vector.broadcast %cst_7 : f32 to vector<8x1xf32>
    %14 = arith.mulf %12, %13 : vector<8x1xf32>
    %15 = math.sqrt %14 : vector<8x1xf32>
    %cst_8 = arith.constant 9.99999997E-7 : f32
    %16 = vector.broadcast %cst_8 : f32 to vector<8x1xf32>
    %17 = arith.addf %15, %16 : vector<8x1xf32>
    %18 = tpu.reciprocal %17 {approx = true} : vector<8x1xf32> -> vector<8x1xf32>
    %19 = vector.broadcast %2 : f32 to vector<8x1xf32>
    %20 = arith.mulf %19, %18 : vector<8x1xf32>
    %21 = vector.broadcast %20 : vector<8x1xf32> to vector<8x32xf32>
    %22 = arith.mulf %21, %9 : vector<8x32xf32>
    %23 = vector.broadcast %3 : f32 to vector<8x32xf32>
    %24 = arith.addf %22, %23 : vector<8x32xf32>
    %25 = arith.truncf %24 : vector<8x32xf32> to vector<8x32xbf16>
    %c0_9 = arith.constant 0 : index
    %c0_10 = arith.constant 0 : index
    %26 = vector.load %arg4[%c0_9, %c0_10] : memref<32x96xbf16, #tpu.memory_space<vmem>>, vector<32x96xbf16>
    %cst_11 = arith.constant dense<0.000000e+00> : vector<8x96xf32>
    %27 = tpu.matmul %25, %26, %cst_11 {dimension_numbers = #tpu.dot_dimension_numbers<[1], [0], [0], [1], [0, 0, 1, 1], [], []>} : vector<8x32xbf16>, vector<32x96xbf16>, vector<8x96xf32> -> vector<8x96xf32>
    %c0_12 = arith.constant 0 : index
    %c0_13 = arith.constant 0 : index
    %28 = vector.load %arg5[%c0_12, %c0_13] : memref<1x96xf32, #tpu.memory_space<vmem>>, vector<1x96xf32>
    %29 = vector.broadcast %28 : vector<1x96xf32> to vector<8x96xf32>
    %30 = arith.addf %27, %29 : vector<8x96xf32>
    %31 = arith.truncf %30 : vector<8x96xf32> to vector<8x96xbf16>
    %c0_14 = arith.constant 0 : index
    %c0_15 = arith.constant 0 : index
    %32 = vector.load %arg13[%c0_14, %c0_15] : memref<8x96xbf16, #tpu.memory_space<vmem>>, vector<8x96xbf16>
    tpu.vector_store %arg13[%c0_14, %c0_15], %31 {strides = array<i32>} : memref<8x96xbf16, #tpu.memory_space<vmem>>, vector<8x96xbf16>,
    %c0_16 = arith.constant 0 : index
    %c0_17 = arith.constant 0 : index
    %c0_18 = arith.constant 0 : index
    %33 = vector.load %arg3[%c0_16, %c0_17, %c0_18] : memref<1x1x8xf32, #tpu.memory_space<vmem>>, vector<1x1x8xf32>
    %34 = vector.shape_cast %33 : vector<1x1x8xf32> to vector<1x8xf32>
    %c0_19 = arith.constant 0 : index
    %c32 = arith.constant 32 : index
    %35 = vector.load %arg13[%c0_19, %c32] : memref<8x96xbf16, #tpu.memory_space<vmem>>, vector<8x8xbf16>
    %c0_20 = arith.constant 0 : index
    %c64 = arith.constant 64 : index
    %36 = vector.load %arg13[%c0_20, %c64] : memref<8x96xbf16, #tpu.memory_space<vmem>>, vector<8x8xbf16>
    %c0_i32 = arith.constant 0 : i32
    %c1_i32 = arith.constant 1 : i32
    %37 = arith.muli %c0_i32, %c1_i32 : i32
    %c0_i32_21 = arith.constant 0 : i32
    %38 = arith.addi %c0_i32_21, %37 : i32
    %c8_i32 = arith.constant 8 : i32
    %39 = arith.muli %38, %c8_i32 : i32
    %40 = tpu.assume_multiple %39, 8 : i32
    %41 = arith.index_cast %40 : i32 to index
    %c0_22 = arith.constant 0 : index
    %42 = vector.load %arg13[%41, %c0_22] : memref<8x96xbf16, #tpu.memory_space<vmem>>, vector<8x8xbf16>
    %cst_23 = arith.constant dense<0.000000e+00> : vector<8x8xf32>
    %43 = tpu.matmul %42, %35, %cst_23 {dimension_numbers = #tpu.dot_dimension_numbers<[1], [1], [0], [0], [0, 0, 1, 0], [], []>} : vector<8x8xbf16>, vector<8x8xbf16>, vector<8x8xf32> -> vector<8x8xf32>
    %44 = vector.broadcast %34 : vector<1x8xf32> to vector<8x8xf32>
    %45 = arith.addf %43, %44 : vector<8x8xf32>
    %cst_24 = arith.constant dense<0xFF800000> : vector<8xf32>
    %46 = vector.multi_reduction <maximumf>, %45, %cst_24 [1] : vector<8x8xf32> to vector<8xf32>
    %47 = vector.shape_cast %46 : vector<8xf32> to vector<8x1xf32>
    %48 = vector.broadcast %47 : vector<8x1xf32> to vector<8x8xf32>
    %49 = arith.subf %45, %48 : vector<8x8xf32>
    %50 = math.exp %49 : vector<8x8xf32>
    %cst_25 = arith.constant dense<0.000000e+00> : vector<8xf32>
    %51 = vector.multi_reduction <add>, %50, %cst_25 [1] : vector<8x8xf32> to vector<8xf32>
    %52 = vector.shape_cast %51 : vector<8xf32> to vector<8x1xf32>
    %53 = tpu.reciprocal %52 {approx = true} : vector<8x1xf32> -> vector<8x1xf32>
    %54 = vector.broadcast %53 : vector<8x1xf32> to vector<8x8xf32>
    %55 = arith.mulf %50, %54 : vector<8x8xf32>
    %56 = arith.truncf %55 : vector<8x8xf32> to vector<8x8xbf16>
    %cst_26 = arith.constant dense<0.000000e+00> : vector<8x8xf32>
    %57 = tpu.matmul %56, %36, %cst_26 {dimension_numbers = #tpu.dot_dimension_numbers<[1], [0], [0], [1], [0, 0, 1, 1], [], []>} : vector<8x8xbf16>, vector<8x8xbf16>, vector<8x8xf32> -> vector<8x8xf32>
    %58 = arith.truncf %57 : vector<8x8xf32> to vector<8x8xbf16>
    %59 = arith.index_cast %40 : i32 to index
    %c0_27 = arith.constant 0 : index
    %60 = vector.load %arg14[%59, %c0_27] : memref<8x32xbf16, #tpu.memory_space<vmem>>, vector<8x8xbf16>
    tpu.vector_store %arg14[%59, %c0_27], %58 {strides = array<i32>} : memref<8x32xbf16, #tpu.memory_space<vmem>>, vector<8x8xbf16>,
    %c1_i32_28 = arith.constant 1 : i32
    %c0_29 = arith.constant 0 : index
    %c40 = arith.constant 40 : index
    %61 = vector.load %arg13[%c0_29, %c40] : memref<8x96xbf16, #tpu.memory_space<vmem>>, vector<8x8xbf16>
    %c0_30 = arith.constant 0 : index
    %c72 = arith.constant 72 : index
    %62 = vector.load %arg13[%c0_30, %c72] : memref<8x96xbf16, #tpu.memory_space<vmem>>, vector<8x8xbf16>
    %c0_i32_31 = arith.constant 0 : i32
    %c1_i32_32 = arith.constant 1 : i32
    %63 = arith.muli %c0_i32_31, %c1_i32_32 : i32
    %c0_i32_33 = arith.constant 0 : i32
    %64 = arith.addi %c0_i32_33, %63 : i32
    %c8_i32_34 = arith.constant 8 : i32
    %65 = arith.muli %64, %c8_i32_34 : i32
    %66 = tpu.assume_multiple %65, 8 : i32
    %67 = arith.index_cast %66 : i32 to index
    %c8 = arith.constant 8 : index
    %68 = vector.load %arg13[%67, %c8] : memref<8x96xbf16, #tpu.memory_space<vmem>>, vector<8x8xbf16>
    %cst_35 = arith.constant dense<0.000000e+00> : vector<8x8xf32>
    %69 = tpu.matmul %68, %61, %cst_35 {dimension_numbers = #tpu.dot_dimension_numbers<[1], [1], [0], [0], [0, 0, 1, 0], [], []>} : vector<8x8xbf16>, vector<8x8xbf16>, vector<8x8xf32> -> vector<8x8xf32>
    %70 = vector.broadcast %34 : vector<1x8xf32> to vector<8x8xf32>
    %71 = arith.addf %69, %70 : vector<8x8xf32>
    %cst_36 = arith.constant dense<0xFF800000> : vector<8xf32>
    %72 = vector.multi_reduction <maximumf>, %71, %cst_36 [1] : vector<8x8xf32> to vector<8xf32>
    %73 = vector.shape_cast %72 : vector<8xf32> to vector<8x1xf32>
    %74 = vector.broadcast %73 : vector<8x1xf32> to vector<8x8xf32>
    %75 = arith.subf %71, %74 : vector<8x8xf32>
    %76 = math.exp %75 : vector<8x8xf32>
    %cst_37 = arith.constant dense<0.000000e+00> : vector<8xf32>
    %77 = vector.multi_reduction <add>, %76, %cst_37 [1] : vector<8x8xf32> to vector<8xf32>
    %78 = vector.shape_cast %77 : vector<8xf32> to vector<8x1xf32>
    %79 = tpu.reciprocal %78 {approx = true} : vector<8x1xf32> -> vector<8x1xf32>
    %80 = vector.broadcast %79 : vector<8x1xf32> to vector<8x8xf32>
    %81 = arith.mulf %76, %80 : vector<8x8xf32>
    %82 = arith.truncf %81 : vector<8x8xf32> to vector<8x8xbf16>
    %cst_38 = arith.constant dense<0.000000e+00> : vector<8x8xf32>
    %83 = tpu.matmul %82, %62, %cst_38 {dimension_numbers = #tpu.dot_dimension_numbers<[1], [0], [0], [1], [0, 0, 1, 1], [], []>} : vector<8x8xbf16>, vector<8x8xbf16>, vector<8x8xf32> -> vector<8x8xf32>
    %84 = arith.truncf %83 : vector<8x8xf32> to vector<8x8xbf16>
    %85 = arith.index_cast %66 : i32 to index
    %c8_39 = arith.constant 8 : index
    %86 = vector.load %arg14[%85, %c8_39] : memref<8x32xbf16, #tpu.memory_space<vmem>>, vector<8x8xbf16>
    tpu.vector_store %arg14[%85, %c8_39], %84 {strides = array<i32>} : memref<8x32xbf16, #tpu.memory_space<vmem>>, vector<8x8xbf16>,
    %c1_i32_40 = arith.constant 1 : i32
    %c0_41 = arith.constant 0 : index
    %c48 = arith.constant 48 : index
    %87 = vector.load %arg13[%c0_41, %c48] : memref<8x96xbf16, #tpu.memory_space<vmem>>, vector<8x8xbf16>
    %c0_42 = arith.constant 0 : index
    %c80 = arith.constant 80 : index
    %88 = vector.load %arg13[%c0_42, %c80] : memref<8x96xbf16, #tpu.memory_space<vmem>>, vector<8x8xbf16>
    %c0_i32_43 = arith.constant 0 : i32
    %c1_i32_44 = arith.constant 1 : i32
    %89 = arith.muli %c0_i32_43, %c1_i32_44 : i32
    %c0_i32_45 = arith.constant 0 : i32
    %90 = arith.addi %c0_i32_45, %89 : i32
    %c8_i32_46 = arith.constant 8 : i32
    %91 = arith.muli %90, %c8_i32_46 : i32
    %92 = tpu.assume_multiple %91, 8 : i32
    %93 = arith.index_cast %92 : i32 to index
    %c16 = arith.constant 16 : index
    %94 = vector.load %arg13[%93, %c16] : memref<8x96xbf16, #tpu.memory_space<vmem>>, vector<8x8xbf16>
    %cst_47 = arith.constant dense<0.000000e+00> : vector<8x8xf32>
    %95 = tpu.matmul %94, %87, %cst_47 {dimension_numbers = #tpu.dot_dimension_numbers<[1], [1], [0], [0], [0, 0, 1, 0], [], []>} : vector<8x8xbf16>, vector<8x8xbf16>, vector<8x8xf32> -> vector<8x8xf32>
    %96 = vector.broadcast %34 : vector<1x8xf32> to vector<8x8xf32>
    %97 = arith.addf %95, %96 : vector<8x8xf32>
    %cst_48 = arith.constant dense<0xFF800000> : vector<8xf32>
    %98 = vector.multi_reduction <maximumf>, %97, %cst_48 [1] : vector<8x8xf32> to vector<8xf32>
    %99 = vector.shape_cast %98 : vector<8xf32> to vector<8x1xf32>
    %100 = vector.broadcast %99 : vector<8x1xf32> to vector<8x8xf32>
    %101 = arith.subf %97, %100 : vector<8x8xf32>
    %102 = math.exp %101 : vector<8x8xf32>
    %cst_49 = arith.constant dense<0.000000e+00> : vector<8xf32>
    %103 = vector.multi_reduction <add>, %102, %cst_49 [1] : vector<8x8xf32> to vector<8xf32>
    %104 = vector.shape_cast %103 : vector<8xf32> to vector<8x1xf32>
    %105 = tpu.reciprocal %104 {approx = true} : vector<8x1xf32> -> vector<8x1xf32>
    %106 = vector.broadcast %105 : vector<8x1xf32> to vector<8x8xf32>
    %107 = arith.mulf %102, %106 : vector<8x8xf32>
    %108 = arith.truncf %107 : vector<8x8xf32> to vector<8x8xbf16>
    %cst_50 = arith.constant dense<0.000000e+00> : vector<8x8xf32>
    %109 = tpu.matmul %108, %88, %cst_50 {dimension_numbers = #tpu.dot_dimension_numbers<[1], [0], [0], [1], [0, 0, 1, 1], [], []>} : vector<8x8xbf16>, vector<8x8xbf16>, vector<8x8xf32> -> vector<8x8xf32>
    %110 = arith.truncf %109 : vector<8x8xf32> to vector<8x8xbf16>
    %111 = arith.index_cast %92 : i32 to index
    %c16_51 = arith.constant 16 : index
    %112 = vector.load %arg14[%111, %c16_51] : memref<8x32xbf16, #tpu.memory_space<vmem>>, vector<8x8xbf16>
    tpu.vector_store %arg14[%111, %c16_51], %110 {strides = array<i32>} : memref<8x32xbf16, #tpu.memory_space<vmem>>, vector<8x8xbf16>,
    %c1_i32_52 = arith.constant 1 : i32
    %c0_53 = arith.constant 0 : index
    %c56 = arith.constant 56 : index
    %113 = vector.load %arg13[%c0_53, %c56] : memref<8x96xbf16, #tpu.memory_space<vmem>>, vector<8x8xbf16>
    %c0_54 = arith.constant 0 : index
    %c88 = arith.constant 88 : index
    %114 = vector.load %arg13[%c0_54, %c88] : memref<8x96xbf16, #tpu.memory_space<vmem>>, vector<8x8xbf16>
    %c0_i32_55 = arith.constant 0 : i32
    %c1_i32_56 = arith.constant 1 : i32
    %115 = arith.muli %c0_i32_55, %c1_i32_56 : i32
    %c0_i32_57 = arith.constant 0 : i32
    %116 = arith.addi %c0_i32_57, %115 : i32
    %c8_i32_58 = arith.constant 8 : i32
    %117 = arith.muli %116, %c8_i32_58 : i32
    %118 = tpu.assume_multiple %117, 8 : i32
    %119 = arith.index_cast %118 : i32 to index
    %c24 = arith.constant 24 : index
    %120 = vector.load %arg13[%119, %c24] : memref<8x96xbf16, #tpu.memory_space<vmem>>, vector<8x8xbf16>
    %cst_59 = arith.constant dense<0.000000e+00> : vector<8x8xf32>
    %121 = tpu.matmul %120, %113, %cst_59 {dimension_numbers = #tpu.dot_dimension_numbers<[1], [1], [0], [0], [0, 0, 1, 0], [], []>} : vector<8x8xbf16>, vector<8x8xbf16>, vector<8x8xf32> -> vector<8x8xf32>
    %122 = vector.broadcast %34 : vector<1x8xf32> to vector<8x8xf32>
    %123 = arith.addf %121, %122 : vector<8x8xf32>
    %cst_60 = arith.constant dense<0xFF800000> : vector<8xf32>
    %124 = vector.multi_reduction <maximumf>, %123, %cst_60 [1] : vector<8x8xf32> to vector<8xf32>
    %125 = vector.shape_cast %124 : vector<8xf32> to vector<8x1xf32>
    %126 = vector.broadcast %125 : vector<8x1xf32> to vector<8x8xf32>
    %127 = arith.subf %123, %126 : vector<8x8xf32>
    %128 = math.exp %127 : vector<8x8xf32>
    %cst_61 = arith.constant dense<0.000000e+00> : vector<8xf32>
    %129 = vector.multi_reduction <add>, %128, %cst_61 [1] : vector<8x8xf32> to vector<8xf32>
    %130 = vector.shape_cast %129 : vector<8xf32> to vector<8x1xf32>
    %131 = tpu.reciprocal %130 {approx = true} : vector<8x1xf32> -> vector<8x1xf32>
    %132 = vector.broadcast %131 : vector<8x1xf32> to vector<8x8xf32>
    %133 = arith.mulf %128, %132 : vector<8x8xf32>
    %134 = arith.truncf %133 : vector<8x8xf32> to vector<8x8xbf16>
    %cst_62 = arith.constant dense<0.000000e+00> : vector<8x8xf32>
    %135 = tpu.matmul %134, %114, %cst_62 {dimension_numbers = #tpu.dot_dimension_numbers<[1], [0], [0], [1], [0, 0, 1, 1], [], []>} : vector<8x8xbf16>, vector<8x8xbf16>, vector<8x8xf32> -> vector<8x8xf32>
    %136 = arith.truncf %135 : vector<8x8xf32> to vector<8x8xbf16>
    %137 = arith.index_cast %118 : i32 to index
    %c24_63 = arith.constant 24 : index
    %138 = vector.load %arg14[%137, %c24_63] : memref<8x32xbf16, #tpu.memory_space<vmem>>, vector<8x8xbf16>
    tpu.vector_store %arg14[%137, %c24_63], %136 {strides = array<i32>} : memref<8x32xbf16, #tpu.memory_space<vmem>>, vector<8x8xbf16>,
    %c1_i32_64 = arith.constant 1 : i32
    %c0_65 = arith.constant 0 : index
    %c0_66 = arith.constant 0 : index
    %139 = vector.load %arg14[%c0_65, %c0_66] : memref<8x32xbf16, #tpu.memory_space<vmem>>, vector<8x32xbf16>
    %c0_67 = arith.constant 0 : index
    %c0_68 = arith.constant 0 : index
    %140 = vector.load %arg6[%c0_67, %c0_68] : memref<32x32xbf16, #tpu.memory_space<vmem>>, vector<32x32xbf16>
    %cst_69 = arith.constant dense<0.000000e+00> : vector<8x32xf32>
    %141 = tpu.matmul %139, %140, %cst_69 {dimension_numbers = #tpu.dot_dimension_numbers<[1], [0], [0], [1], [0, 0, 1, 1], [], []>} : vector<8x32xbf16>, vector<32x32xbf16>, vector<8x32xf32> -> vector<8x32xf32>
    %c0_70 = arith.constant 0 : index
    %c0_71 = arith.constant 0 : index
    %142 = vector.load %arg7[%c0_70, %c0_71] : memref<1x32xf32, #tpu.memory_space<vmem>>, vector<1x32xf32>
    %143 = vector.broadcast %142 : vector<1x32xf32> to vector<8x32xf32>
    %144 = arith.addf %141, %143 : vector<8x32xf32>
    %145 = arith.addf %1, %144 : vector<8x32xf32>
    %c1_72 = arith.constant 1 : index
    %c0_73 = arith.constant 0 : index
    %146 = memref.load %arg1[%c1_72, %c0_73] : memref<2x2xf32, #tpu.memory_space<smem>>
    %c1_74 = arith.constant 1 : index
    %c1_75 = arith.constant 1 : index
    %147 = memref.load %arg1[%c1_74, %c1_75] : memref<2x2xf32, #tpu.memory_space<smem>>
    %cst_76 = arith.constant dense<0.000000e+00> : vector<8xf32>
    %148 = vector.multi_reduction <add>, %145, %cst_76 [1] : vector<8x32xf32> to vector<8xf32>
    %149 = vector.shape_cast %148 : vector<8xf32> to vector<8x1xf32>
    %cst_77 = arith.constant 3.200000e+01 : f32
    %150 = vector.broadcast %cst_77 : f32 to vector<8x1xf32>
    %151 = arith.divf %149, %150 : vector<8x1xf32>
    %152 = vector.broadcast %151 : vector<8x1xf32> to vector<8x32xf32>
    %153 = arith.subf %145, %152 : vector<8x32xf32>
    %154 = arith.mulf %153, %153 : vector<8x32xf32>
    %cst_78 = arith.constant dense<0.000000e+00> : vector<8xf32>
    %155 = vector.multi_reduction <add>, %154, %cst_78 [1] : vector<8x32xf32> to vector<8xf32>
    %156 = vector.shape_cast %155 : vector<8xf32> to vector<8x1xf32>
    %cst_79 = arith.constant 0.0322580636 : f32
    %157 = vector.broadcast %cst_79 : f32 to vector<8x1xf32>
    %158 = arith.mulf %156, %157 : vector<8x1xf32>
    %159 = math.sqrt %158 : vector<8x1xf32>
    %cst_80 = arith.constant 9.99999997E-7 : f32
    %160 = vector.broadcast %cst_80 : f32 to vector<8x1xf32>
    %161 = arith.addf %159, %160 : vector<8x1xf32>
    %162 = tpu.reciprocal %161 {approx = true} : vector<8x1xf32> -> vector<8x1xf32>
    %163 = vector.broadcast %146 : f32 to vector<8x1xf32>
    %164 = arith.mulf %163, %162 : vector<8x1xf32>
    %165 = vector.broadcast %164 : vector<8x1xf32> to vector<8x32xf32>
    %166 = arith.mulf %165, %153 : vector<8x32xf32>
    %167 = vector.broadcast %147 : f32 to vector<8x32xf32>
    %168 = arith.addf %166, %167 : vector<8x32xf32>
    %169 = arith.truncf %168 : vector<8x32xf32> to vector<8x32xbf16>
    %cst_81 = arith.constant 0.000000e+00 : f32
    %170 = vector.broadcast %cst_81 : f32 to vector<8x32xf32>
    %c0_82 = arith.constant 0 : index
    %c0_83 = arith.constant 0 : index
    %171 = vector.load %arg8[%c0_82, %c0_83] : memref<32x64xbf16, #tpu.memory_space<vmem>>, vector<32x64xbf16>
    %cst_84 = arith.constant dense<0.000000e+00> : vector<8x64xf32>
    %172 = tpu.matmul %169, %171, %cst_84 {dimension_numbers = #tpu.dot_dimension_numbers<[1], [0], [0], [1], [0, 0, 1, 1], [], []>} : vector<8x32xbf16>, vector<32x64xbf16>, vector<8x64xf32> -> vector<8x64xf32>
    %c0_85 = arith.constant 0 : index
    %c0_86 = arith.constant 0 : index
    %173 = vector.load %arg9[%c0_85, %c0_86] : memref<1x64xf32, #tpu.memory_space<vmem>>, vector<1x64xf32>
    %174 = vector.broadcast %173 : vector<1x64xf32> to vector<8x64xf32>
    %175 = arith.addf %172, %174 : vector<8x64xf32>
    %cst_87 = arith.constant 0.000000e+00 : f32
    %176 = vector.broadcast %cst_87 : f32 to vector<8x64xf32>
    %177 = arith.maximumf %175, %176 : vector<8x64xf32>
    %178 = arith.truncf %177 : vector<8x64xf32> to vector<8x64xbf16>
    %c0_88 = arith.constant 0 : index
    %c0_89 = arith.constant 0 : index
    %179 = vector.load %arg10[%c0_88, %c0_89] : memref<64x32xbf16, #tpu.memory_space<vmem>>, vector<64x32xbf16>
    %cst_90 = arith.constant dense<0.000000e+00> : vector<8x32xf32>
    %180 = tpu.matmul %178, %179, %cst_90 {dimension_numbers = #tpu.dot_dimension_numbers<[1], [0], [0], [1], [0, 0, 1, 1], [], []>} : vector<8x64xbf16>, vector<64x32xbf16>, vector<8x32xf32> -> vector<8x32xf32>
    %181 = arith.addf %170, %180 : vector<8x32xf32>
    %c0_91 = arith.constant 0 : index
    %c0_92 = arith.constant 0 : index
    %182 = vector.load %arg11[%c0_91, %c0_92] : memref<1x32xf32, #tpu.memory_space<vmem>>, vector<1x32xf32>
    %183 = vector.broadcast %182 : vector<1x32xf32> to vector<8x32xf32>
    %184 = arith.addf %181, %183 : vector<8x32xf32>
    %185 = arith.addf %145, %184 : vector<8x32xf32>
    %c0_93 = arith.constant 0 : index
    %c0_94 = arith.constant 0 : index
    %c0_95 = arith.constant 0 : index
    %186 = vector.load %arg12[%c0_93, %c0_94, %c0_95] : memref<1x8x32xf32, #tpu.memory_space<vmem>>, vector<1x8x32xf32>
    %187 = vector.shape_cast %186 : vector<1x8x32xf32> to vector<8x32xf32>
    %188 = vector.shape_cast %185 : vector<8x32xf32> to vector<1x8x32xf32>
    tpu.vector_store %arg12[%c0_93, %c0_94, %c0_95], %188 {strides = array<i32>} : memref<1x8x32xf32, #tpu.memory_space<vmem>>, vector<1x8x32xf32>,
    return
  }
  func.func @transform_0(%arg0: i32) -> (i32, i32) {
    %c0_i32 = arith.constant 0 : i32
    %c0_i32_0 = arith.constant 0 : i32
    %c0_i32_1 = arith.constant 0 : i32
    return %c0_i32, %c0_i32_0 : i32, i32
  }
  func.func @transform_1(%arg0: i32) -> (i32, i32, i32) {
    %c0_i32 = arith.constant 0 : i32
    %c0_i32_0 = arith.constant 0 : i32
    %c0_i32_1 = arith.constant 0 : i32
    return %arg0, %c0_i32, %c0_i32_0 : i32, i32, i32
  }
  func.func @transform_2(%arg0: i32) -> (i32, i32, i32) {
    %c0_i32 = arith.constant 0 : i32
    %c0_i32_0 = arith.constant 0 : i32
    %c0_i32_1 = arith.constant 0 : i32
    return %arg0, %c0_i32, %c0_i32_0 : i32, i32, i32
  }
  func.func @transform_3(%arg0: i32) -> (i32, i32) {
    %c0_i32 = arith.constant 0 : i32
    %c0_i32_0 = arith.constant 0 : i32
    %c0_i32_1 = arith.constant 0 : i32
    return %c0_i32, %c0_i32_0 : i32, i32
  }
  func.func @transform_4(%arg0: i32) -> (i32, i32) {
    %c0_i32 = arith.constant 0 : i32
    %c0_i32_0 = arith.constant 0 : i32
    %c0_i32_1 = arith.constant 0 : i32
    return %c0_i32, %c0_i32_0 : i32, i32
  }
  func.func @transform_5(%arg0: i32) -> (i32, i32) {
    %c0_i32 = arith.constant 0 : i32
    %c0_i32_0 = arith.constant 0 : i32
    %c0_i32_1 = arith.constant 0 : i32
    return %c0_i32, %c0_i32_0 : i32, i32
  }
  func.func @transform_6(%arg0: i32) -> (i32, i32) {
    %c0_i32 = arith.constant 0 : i32
    %c0_i32_0 = arith.constant 0 : i32
    %c0_i32_1 = arith.constant 0 : i32
    return %c0_i32, %c0_i32_0 : i32, i32
  }
  func.func @transform_7(%arg0: i32) -> (i32, i32) {
    %c0_i32 = arith.constant 0 : i32
    %c0_i32_0 = arith.constant 0 : i32
    %c0_i32_1 = arith.constant 0 : i32
    return %c0_i32, %c0_i32_0 : i32, i32
  }
  func.func @transform_8(%arg0: i32) -> (i32, i32) {
    %c0_i32 = arith.constant 0 : i32
    %c0_i32_0 = arith.constant 0 : i32
    %c0_i32_1 = arith.constant 0 : i32
    return %c0_i32, %c0_i32_0 : i32, i32
  }
  func.func @transform_9(%arg0: i32) -> (i32, i32) {
    %c0_i32 = arith.constant 0 : i32
    %c0_i32_0 = arith.constant 0 : i32
    %c0_i32_1 = arith.constant 0 : i32
    return %c0_i32, %c0_i32_0 : i32, i32
  }
  func.func @transform_10(%arg0: i32) -> (i32, i32) {
    %c0_i32 = arith.constant 0 : i32
    %c0_i32_0 = arith.constant 0 : i32
    %c0_i32_1 = arith.constant 0 : i32
    return %c0_i32, %c0_i32_0 : i32, i32
  }
  func.func @transform_11(%arg0: i32) -> (i32, i32, i32) {
    %c0_i32 = arith.constant 0 : i32
    %c0_i32_0 = arith.constant 0 : i32
    %c0_i32_1 = arith.constant 0 : i32
    return %arg0, %c0_i32, %c0_i32_0 : i32, i32, i32
  }
}

</mosaic_0001>

<bundles_post_ra>
// kernel: tpu_custom_call.1
= control target key start
LH: loop header
LB: loop body
LE: loop exit
PB: predicated region body
PF: predicated region fallthrough
CT: control target
= control target key end

     0   :  { %s3011_s0 = inlined_call_operand.hbm [shape: f32[2,2], index: 0, kind: input, shape index: {}]   ;;  %s3012_s1 = inlined_call_operand.hbm [shape: f32[2,8,32], index: 1, kind: input, shape index: {}]   ;;  %s3013_s2 = inlined_call_operand.hbm [shape: f32[2,1,8], index: 2, kind: input, shape index: {}]   ;;  %s3014_s3 = inlined_call_operand.hbm [shape: bf16[32,96], index: 3, kind: input, shape index: {}]   ;;  %s3015_s4 = inlined_call_operand.hbm [shape: f32[1,96], index: 4, kind: input, shape index: {}]   ;;  %s3016_s5 = inlined_call_operand.hbm [shape: bf16[32,32], index: 5, kind: input, shape index: {}]   ;;  %s3017_s6 = inlined_call_operand.hbm [shape: f32[1,32], index: 6, kind: input, shape index: {}]   ;;  %s3018_s7 = inlined_call_operand.hbm [shape: bf16[32,64], index: 7, kind: input, shape index: {}]   ;;  %s3019_s8 = inlined_call_operand.hbm [shape: f32[1,64], index: 8, kind: input, shape index: {}]   ;;  %s3020_s9 = inlined_call_operand.hbm [shape: bf16[64,32], index: 9, kind: input, shape index: {}]   ;;  %s3021_s10 = inlined_call_operand.hbm [shape: f32[1,32], index: 10, kind: input, shape index: {}]   ;;  %s3022_s11 = inlined_call_operand.hbm [shape: f32[2,8,32], index: 11, kind: output, shape index: {}]  }
   0x1   :  { %3032 = sst [smem:[#allocation34_spill]] %s3011_s0 }
   0x2   :  { %3033 = sst [smem:[#allocation35_spill]] %s3012_s1 }
   0x3   :  { %3034 = sst [smem:[#allocation36_spill]] %s3013_s2 }
   0x4   :  { %3035 = sst [smem:[#allocation37_spill]] %s3014_s3 }
   0x5   :  { %3036 = sst [smem:[#allocation38_spill]] %s3015_s4 }
   0x6   :  { %3037 = sst [smem:[#allocation39_spill]] %s3022_s11 }
   0x7   :  { %16 = vsyncpa [#allocation7], 0 }
   0x8   :  { %17 = vsyncpa [#allocation5], 0 }
   0x9   :  { %19 = vsyncpa [#allocation5 + $0x1], 0 }
   0xa   :  { %20 = vsyncpa [#allocation10], 0 }
   0xb   :  { %22 = vsyncpa [#allocation10 + $0x1], 0 }
   0xc   :  { %23 = vsyncpa [#allocation13], 0 }
   0xd   :  { %24 = vsyncpa [#allocation16], 0 }
   0xe   :  { %25 = vsyncpa [#allocation19], 0 }
   0xf   :  { %26 = vsyncpa [#allocation22], 0 }
  0x10   :  { %27 = vsyncpa [#allocation6], 0 }
  0x11   :  { %29 = vsyncpa [#allocation6 + $0x1], 0  ;;  %s2474_s17 = smov 0   ;;  %s2476_s18 = smov 0  }
  0x12   :  { %s2478_s19 = smov 0   ;;  %s2480_s20 = smov 0  }
  0x13 LB: > { %s2384_s21 = smov [#allocation11]   ;;  %s2495_s23 = sadd.s32 4294967295, %s2382_s20   ;;  %s2382_s20 = sphi %s2480_s20, %s3076_s20   ;;  %s2378_s19 = sphi %s2478_s19, %s3075_s19   ;;  %s2374_s18 = sphi %s2476_s18, %s3074_s18   ;;  %s2370_s17 = sphi %s2474_s17, %s3073_s17  }
  0x14   : > { %s328_s22 = sshll.u32 %s2384_s21, 4  ;;  %p1603_p0 = scmp.ge.s32.totalorder %s2382_s20, 1  ;;  %s2500_s22 = int_to_ptr.vmem [resolvable:$true] %s328_s22 }
  0x15   : > { %p3026_p1 = scmp.eq.s32.totalorder %s2495_s23, 0  ;;  %p307_p2 = scmp.lt.s32.totalorder %s2382_s20, 3 }
  0x16   : > { %s2385_s25 = smov [#allocation12]   ;;  %s2386_s28 = smov [#allocation15]  }
  0x17   : > { %p2502_p3 = pnand %p1603_p0, %p307_p2  ;;  %s342_s26 = sshll.u32 %s2385_s25, 4  ;;  %s2515_s26 = int_to_ptr.vmem [resolvable:$true] %s342_s26 }
  0x18   : > { %s366_s29 = sshll.u32 %s2386_s28, 4  ;;  %s3041_s3 = sld [smem:[#allocation37_spill]]  ;;  %s2517_s29 = int_to_ptr.vmem [resolvable:$true] %s366_s29 }
  0x19   : > { %s3038_s24 = scalar_select %p2502_p3, 1, 0 }
  0x1a   : > { %p1832_p5 = pneg %p2502_p3 }
  0x1b   : > { %3039 = sst [smem:[#allocation33_spill]] %s3038_s24 }
  0x1c   : > { %p2511_p6 = pnand %p1832_p5, %p3026_p1 }
  0x1e   : > { %s1991_s13 = scalar_lea.hbm %s3041_s3, 256  ;;  %p2527_p8 = pneg %p2511_p6 }
  0x1f   : > { %p1992_p7 = scmp.ne.s32.totalorder %s3041_s3, %s1991_s13  ;;  %p1998_p11 = scmp.lt.u32.totalorder %s1991_s13, %s3041_s3 }
  0x21   : > { %p1994_p9 = pnand %p2527_p8, %p1992_p7 }
  0x23   : > { %p1995_p10 = pneg %p1994_p9 }
  0x25   : > { %p2000_p12 = pnand %p1998_p11, %p1995_p10 }
  0x27   : > { %2003 = shalt.err (!%p2000_p12)
}
  0x28   : > { %s2004_s28 = scalar_lea.vmem %s2500_s22, 256  ;;  %p2012_p5 = scmp.lt.s32.totalorder %s2500_s22, %s2500_s22 }
  0x29   : > { %p2005_p13 = scmp.ne.s32.totalorder %s2500_s22, %s2004_s28  ;;  %p2013_p4 = scmp.lt.s32.totalorder %s2004_s28, %s2004_s28 }
  0x2b   : > { %p2007_p0 = pnand %p2005_p13, %p2527_p8  ;;  %p2014_p7 = por %p2013_p4, %p2012_p5 }
  0x2d   : > { %p2008_p2 = pneg %p2007_p0 }
  0x2f   : > { %p2015_p9 = pnand %p2014_p7, %p2008_p2 }
  0x31   : > { %2018 = shalt.err (!%p2015_p9)
}
  0x32   : > { %s3028_s30 = smov 64   ;;  %s2388_s12 = smov 4  }
  0x33   : > { %1838 = dma.hbm_to_vmem [thread:$0]  (!%p2511_p6), %s3041_s3, 256, %s2500_s22, [#allocation10], %s3028_s30, %s3028_s30, %s2388_s12  }
  0x34   : > { %s3043_s4 = sld [smem:[#allocation38_spill]] }
  0x3a   : > { %s2019_s25 = scalar_lea.hbm %s3043_s4, 16 }
  0x3b   : > { %p2020_p4 = scmp.ne.s32.totalorder %s3043_s4, %s2019_s25  ;;  %p2026_p12 = scmp.lt.u32.totalorder %s2019_s25, %s3043_s4 }
  0x3d   : > { %p2022_p10 = pnand %p2020_p4, %p2527_p8 }
  0x3f   : > { %p2023_p11 = pneg %p2022_p10 }
  0x41   : > { %p2028_p13 = pnand %p2026_p12, %p2023_p11 }
  0x43   : > { %2031 = shalt.err (!%p2028_p13)
}
  0x44   : > { %s2032_s22 = scalar_lea.vmem %s2515_s26, 16  ;;  %s2039_s11 = scalar_lea.vmem %s2515_s26, 32 }
  0x45   : > { %p2033_p0 = scmp.ne.s32.totalorder %s2515_s26, %s2032_s22  ;;  %p2040_p7 = scmp.lt.s32.totalorder %s2515_s26, %s2515_s26 }
  0x46   : > { %p2041_p9 = scmp.lt.s32.totalorder %s2039_s11, %s2032_s22 }
  0x47   : > { %p2035_p2 = pnand %p2033_p0, %p2527_p8 }
  0x48   : > { %p2042_p4 = por %p2041_p9, %p2040_p7 }
  0x49   : > { %p2036_p5 = pneg %p2035_p2 }
  0x4b   : > { %p2043_p10 = pnand %p2042_p4, %p2036_p5 }
  0x4d   : > { %2046 = shalt.err (!%p2043_p10)
}
  0x4e   : > { %1841 = dma.hbm_to_vmem [thread:$0]  (!%p2511_p6), %s3043_s4, 16, %s2515_s26, [#allocation13]  }
  0x4f   : > { %s2047_s15 = scalar_lea.hbm %s3017_s6, 16 }
  0x50   : > { %p2048_p11 = scmp.ne.s32.totalorder %s3017_s6, %s2047_s15  ;;  %p2054_p0 = scmp.lt.u32.totalorder %s2047_s15, %s3017_s6 }
  0x52   : > { %p2050_p12 = pnand %p2048_p11, %p2527_p8 }
  0x54   : > { %p2051_p13 = pneg %p2050_p12 }
  0x56   : > { %p2056_p2 = pnand %p2054_p0, %p2051_p13 }
  0x58   : > { %2059 = shalt.err (!%p2056_p2)
}
  0x59   : > { %s2060_s26 = scalar_lea.vmem %s2517_s29, 16  ;;  %s2067_s11 = scalar_lea.vmem %s2517_s29, 32 }
  0x5a   : > { %p2061_p5 = scmp.ne.s32.totalorder %s2517_s29, %s2060_s26  ;;  %p2068_p4 = scmp.lt.s32.totalorder %s2517_s29, %s2517_s29 }
  0x5b   : > { %p2069_p10 = scmp.lt.s32.totalorder %s2067_s11, %s2060_s26 }
  0x5c   : > { %p2063_p7 = pnand %p2061_p5, %p2527_p8 }
  0x5d   : > { %p2070_p11 = por %p2069_p10, %p2068_p4 }
  0x5e   : > { %p2064_p9 = pneg %p2063_p7 }
  0x60   : > { %p2071_p12 = pnand %p2070_p11, %p2064_p9 }
  0x62   : > { %2074 = shalt.err (!%p2071_p12)
}
  0x63   : > { %1847 = dma.hbm_to_vmem [thread:$0]  (!%p2511_p6), %s3017_s6, 16, %s2517_s29, [#allocation16]  }
  0x64   : > { %s2389_s13 = smov [#allocation18]   ;;  %s2075_s25 = scalar_lea.hbm %s3019_s8, 16 }
  0x65   : > { %s390_s14 = sshll.u32 %s2389_s13, 4  ;;  %p2076_p13 = scmp.ne.s32.totalorder %s3019_s8, %s2075_s25  ;;  %s391_s14 = int_to_ptr.vmem [resolvable:$true] %s390_s14 }
  0x66   : > { %p2082_p5 = scmp.lt.u32.totalorder %s2075_s25, %s3019_s8 }
  0x67   : > { %p2078_p0 = pnand %p2076_p13, %p2527_p8 }
  0x69   : > { %p2079_p2 = pneg %p2078_p0 }
  0x6b   : > { %p2084_p7 = pnand %p2082_p5, %p2079_p2 }
  0x6d   : > { %2087 = shalt.err (!%p2084_p7)
}
  0x6e   : > { %s2088_s29 = scalar_lea.vmem %s391_s14, 16  ;;  %s2095_s2 = scalar_lea.vmem %s391_s14, 32 }
  0x6f   : > { %p2089_p9 = scmp.ne.s32.totalorder %s391_s14, %s2088_s29  ;;  %p2096_p11 = scmp.lt.s32.totalorder %s391_s14, %s391_s14 }
  0x70   : > { %p2097_p12 = scmp.lt.s32.totalorder %s2095_s2, %s2088_s29 }
  0x71   : > { %p2091_p4 = pnand %p2089_p9, %p2527_p8 }
  0x72   : > { %p2098_p1 = por %p2097_p12, %p2096_p11 }
  0x73   : > { %p2092_p10 = pneg %p2091_p4 }
  0x75   : > { %p2099_p3 = pnand %p2098_p1, %p2092_p10 }
  0x77   : > { %2102 = shalt.err (!%p2099_p3)
}
  0x78   : > { %1853 = dma.hbm_to_vmem [thread:$0]  (!%p2511_p6), %s3019_s8, 16, %s391_s14, [#allocation19]  }
  0x79   : > { %s3044_s0 = sld [smem:[#allocation34_spill]] }
  0x7f   : > { %s2103_s25 = scalar_lea.hbm %s3044_s0, 32 }
  0x80   : > { %p2104_p13 = scmp.ne.s32.totalorder %s3044_s0, %s2103_s25  ;;  %p2110_p1 = scmp.lt.u32.totalorder %s2103_s25, %s3044_s0 }
  0x82   : > { %p2106_p0 = pnand %p2104_p13, %p2527_p8 }
  0x84   : > { %p2107_p2 = pneg %p2106_p0 }
  0x86   : > { %p2112_p3 = pnand %p2110_p1, %p2107_p2 }
  0x88   : > { %2115 = shalt.err (!%p2112_p3)
}
  0x89   : > { %s2390_s29 = smov [#allocation4]   ;;  %s2391_s24 = smov [#allocation14]  }
  0x8a   : > { %1835 = dma.hbm_to_smem (!%p2511_p6), %s3044_s0, 32, %s2390_s29, [#allocation7]  }
  0x8b   : > { %s352_s13 = sshll.u32 %s2391_s24, 4  ;;  %s2392_s15 = smov [#allocation17]   ;;  %s353_s13 = int_to_ptr.vmem [resolvable:$true] %s352_s13 }
  0x8c   : > { %s376_s21 = sshll.u32 %s2392_s15, 4  ;;  %s2116_s26 = scalar_lea.hbm %s3016_s5, 256  ;;  %s377_s21 = int_to_ptr.vmem [resolvable:$true] %s376_s21 }
  0x8d   : > { %p2117_p5 = scmp.ne.s32.totalorder %s3016_s5, %s2116_s26  ;;  %p2123_p4 = scmp.lt.u32.totalorder %s2116_s26, %s3016_s5 }
  0x8f   : > { %p2119_p7 = pnand %p2117_p5, %p2527_p8 }
  0x91   : > { %p2120_p9 = pneg %p2119_p7 }
  0x93   : > { %p2125_p10 = pnand %p2123_p4, %p2120_p9 }
  0x95   : > { %2128 = shalt.err (!%p2125_p10)
}
  0x96   : > { %s2129_s29 = scalar_lea.vmem %s353_s13, 256  ;;  %p2137_p0 = scmp.lt.s32.totalorder %s353_s13, %s353_s13 }
  0x97   : > { %p2130_p11 = scmp.ne.s32.totalorder %s353_s13, %s2129_s29  ;;  %p2138_p2 = scmp.lt.s32.totalorder %s2129_s29, %s2129_s29 }
  0x99   : > { %p2132_p12 = pnand %p2130_p11, %p2527_p8  ;;  %p2139_p1 = por %p2138_p2, %p2137_p0 }
  0x9b   : > { %p2133_p13 = pneg %p2132_p12 }
  0x9d   : > { %p2140_p3 = pnand %p2139_p1, %p2133_p13 }
  0x9f   : > { %2143 = shalt.err (!%p2140_p3)
}
  0xa0   : > { %s3045_s2 = smov 64   ;;  %s2144_s22 = scalar_lea.hbm %s3018_s7, 256 }
  0xa1   : > { %1844 = dma.hbm_to_vmem [thread:$0]  (!%p2511_p6), %s3016_s5, 256, %s353_s13, [#allocation13], %s3045_s2, %s3045_s2, %s2388_s12  }
  0xa2   : > { %p2145_p5 = scmp.ne.s32.totalorder %s3018_s7, %s2144_s22  ;;  %p2151_p4 = scmp.lt.u32.totalorder %s2144_s22, %s3018_s7 }
  0xa4   : > { %p2147_p7 = pnand %p2145_p5, %p2527_p8 }
  0xa6   : > { %p2148_p9 = pneg %p2147_p7 }
  0xa8   : > { %p2153_p10 = pnand %p2151_p4, %p2148_p9 }
  0xaa   : > { %2156 = shalt.err (!%p2153_p10)
}
  0xab   : > { %s2157_s29 = scalar_lea.vmem %s377_s21, 256  ;;  %p2165_p0 = scmp.lt.s32.totalorder %s377_s21, %s377_s21 }
  0xac   : > { %p2158_p11 = scmp.ne.s32.totalorder %s377_s21, %s2157_s29  ;;  %p2166_p2 = scmp.lt.s32.totalorder %s2157_s29, %s2157_s29 }
  0xae   : > { %p2160_p12 = pnand %p2158_p11, %p2527_p8  ;;  %p2167_p1 = por %p2166_p2, %p2165_p0 }
  0xb0   : > { %p2161_p13 = pneg %p2160_p12 }
  0xb2   : > { %p2168_p3 = pnand %p2167_p1, %p2161_p13 }
  0xb4   : > { %2171 = shalt.err (!%p2168_p3)
}
  0xb5   : > { %1850 = dma.hbm_to_vmem [thread:$0]  (!%p2511_p6), %s3018_s7, 256, %s377_s21, [#allocation16], %s3045_s2, %s3045_s2, %s2388_s12  }
  0xb6   : > { %s2393_s24 = smov [#allocation20]   ;;  %s2394_s28 = smov [#allocation21]  }
  0xb7   : > { %s400_s15 = sshll.u32 %s2393_s24, 4  ;;  %s414_s22 = sshll.u32 %s2394_s28, 4  ;;  %s401_s15 = int_to_ptr.vmem [resolvable:$true] %s400_s15  ;;  %s415_s22 = int_to_ptr.vmem [resolvable:$true] %s414_s22 }
  0xb8   : > { %s2172_s11 = scalar_lea.hbm %s3020_s9, 512 }
  0xb9   : > { %p2173_p5 = scmp.ne.s32.totalorder %s3020_s9, %s2172_s11  ;;  %p2179_p4 = scmp.lt.u32.totalorder %s2172_s11, %s3020_s9 }
  0xbb   : > { %p2175_p7 = pnand %p2173_p5, %p2527_p8 }
  0xbd   : > { %p2176_p9 = pneg %p2175_p7 }
  0xbf   : > { %p2181_p10 = pnand %p2179_p4, %p2176_p9 }
  0xc1   : > { %2184 = shalt.err (!%p2181_p10)
}
  0xc2   : > { %s2185_s21 = scalar_lea.vmem %s401_s15, 512  ;;  %p2193_p0 = scmp.lt.s32.totalorder %s401_s15, %s401_s15 }
  0xc3   : > { %p2186_p11 = scmp.ne.s32.totalorder %s401_s15, %s2185_s21  ;;  %p2194_p2 = scmp.lt.s32.totalorder %s2185_s21, %s2185_s21 }
  0xc5   : > { %p2188_p12 = pnand %p2186_p11, %p2527_p8  ;;  %p2195_p1 = por %p2194_p2, %p2193_p0 }
  0xc7   : > { %p2189_p13 = pneg %p2188_p12 }
  0xc9   : > { %p2196_p3 = pnand %p2195_p1, %p2189_p13 }
  0xcb   : > { %2199 = shalt.err (!%p2196_p3)
}
  0xcc   : > { %1856 = dma.hbm_to_vmem [thread:$0]  (!%p2511_p6), %s3020_s9, 512, %s401_s15, [#allocation19], %s3045_s2, %s3045_s2, %s2388_s12  }
  0xcd   : > { %s2200_s26 = scalar_lea.hbm %s3021_s10, 16 }
  0xce   : > { %p2201_p5 = scmp.ne.s32.totalorder %s3021_s10, %s2200_s26  ;;  %p2207_p4 = scmp.lt.u32.totalorder %s2200_s26, %s3021_s10 }
  0xd0   : > { %p2203_p7 = pnand %p2201_p5, %p2527_p8 }
  0xd2   : > { %p2204_p9 = pneg %p2203_p7 }
  0xd4   : > { %p2209_p10 = pnand %p2207_p4, %p2204_p9 }
  0xd6   : > { %2212 = shalt.err (!%p2209_p10)
}
  0xd7   : > { %s2213_s13 = scalar_lea.vmem %s415_s22, 16  ;;  %s2220_s12 = scalar_lea.vmem %s415_s22, 32 }
  0xd8   : > { %p2214_p11 = scmp.ne.s32.totalorder %s415_s22, %s2213_s13  ;;  %p2221_p0 = scmp.lt.s32.totalorder %s415_s22, %s415_s22 }
  0xd9   : > { %p2222_p2 = scmp.lt.s32.totalorder %s2220_s12, %s2213_s13 }
  0xda   : > { %p2216_p12 = pnand %p2214_p11, %p2527_p8 }
  0xdb   : > { %p2223_p1 = por %p2222_p2, %p2221_p0 }
  0xdc   : > { %p2217_p13 = pneg %p2216_p12 }
  0xde   : > { %p2224_p3 = pnand %p2223_p1, %p2217_p13 }
  0xe0   : > { %2227 = shalt.err (!%p2224_p3)
}
  0xe1   : > { %1859 = dma.hbm_to_vmem [thread:$0]  (!%p2511_p6), %s3021_s10, 16, %s415_s22, [#allocation22]  }
  0xe2   : > { %s1602_s16 = sadd.s32 4294967294, %s2382_s20   ;;  %s2716_s27 = sadd.s32 1, %s2382_s20  }
  0xe3   : > { %s63_s21 = sadd.s32 1, %s2378_s19  ;;  %s60_s0 = ssub.s32 %s2382_s20, %s2716_s27 }
  0xe4   : > { %p70_p8 = scmp.ne.s32.totalorder %s2378_s19, %s2374_s18  ;;  %p61_p5 = scmp.eq.s32.totalorder %s60_s0, 0 }
  0xe5   : > { %p71_p7 = scmp.eq.s32.totalorder %s2382_s20, 0  ;;  %p76_p9 = scmp.ne.s32.totalorder %s2374_s18, %s2370_s17 }
  0xe6   : > { %p294_p4 = scmp.eq.s32.totalorder %s2495_s23, 1  ;;  %p3046_p11 = scmp.eq.s32.totalorder %s2495_s23, 0 }
  0xe7   : > { %s2728_s30 = scalar_select %p61_p5, %s2378_s19, %s63_s21  }
  0xe8   : > { %p72_p10 = por %p71_p7, %p70_p8  ;;  %p2732_p12 = por %p3046_p11, %p76_p9 }
  0xe9   : > { %p2736_p6 = por %p294_p4, %p70_p8  ;;  %p300_p13 = scmp.eq.s32.totalorder %s1602_s16, 1 }
  0xea   : > { %s3047_s22 = scalar_select %p2732_p12, 1, 0 }
  0xeb   : > { %s3048_s24 = scalar_select %p2736_p6, 1, 0 }
  0xec   : > { %p1880_p0 = scmp.lt.s32.totalorder %s2382_s20, 2  ;;  %s2742_s28 = sand.u32 1, %s2378_s19  }
  0xed   : > { %p2744_p2 = por %p300_p13, %p76_p9  ;;  %s1614_s25 = sshll.u32 %s2742_s28, 3 }
  0xee   : > { %s1615_s11 = sshll.u32 %s2382_s20, 7  ;;  %s3050_s1 = sld [smem:[#allocation35_spill]] }
  0xef   : > { %s3049_s26 = scalar_select %p2744_p2, 1, 0 }
  0xf0   : > { %s429_s12 = scalar_lea.vmem [#allocation8], %s1614_s25  ;;  %p2755_p1 = pnand %p1880_p0, %p72_p10 }
  0xf1   : > { %s436_s2 = sshll.u32 %s429_s12, 4  ;;  %s426_s21 = scalar_lea.sflag [#allocation5], %s2742_s28  ;;  %s2759_s2 = int_to_ptr.vmem [resolvable:$true] %s436_s2 }
  0xf2   : > { %p2230_p8 = pneg %p2755_p1 }
  0xf4   : > { %s2753_s13 = scalar_lea.hbm %s3050_s1, %s1615_s11  ;;  %s2233_s14 = scalar_lea.hbm %s3050_s1, 256 }
  0xf5   : > { %s2228_s0 = scalar_lea.hbm %s2753_s13, 128  ;;  %p2234_p9 = scmp.lt.u32.totalorder %s2753_s13, %s3050_s1 }
  0xf6   : > { %p2229_p3 = scmp.ne.s32.totalorder %s2753_s13, %s2228_s0  ;;  %p2235_p4 = scmp.lt.u32.totalorder %s2233_s14, %s2228_s0 }
  0xf7   : > { %p2237_p11 = scmp.lt.u32.totalorder %s2228_s0, %s2753_s13 }
  0xf8   : > { %p2231_p5 = pnand %p2230_p8, %p2229_p3  ;;  %p2236_p10 = por %p2235_p4, %p2234_p9 }
  0xfa   : > { %p2232_p7 = pneg %p2231_p5  ;;  %p2238_p13 = por %p2237_p11, %p2236_p10 }
  0xfc   : > { %p2239_p0 = pnand %p2238_p13, %p2232_p7 }
  0xfe   : > { %2242 = shalt.err (!%p2239_p0)
}
  0xff   : > { %s2243_s16 = scalar_lea.vmem %s2759_s2, 128  ;;  %s2395_s25 = smov [#allocation8]  }
 0x100   : > { %p2244_p3 = scmp.ne.s32.totalorder %s2759_s2, %s2243_s16  ;;  %s2248_s11 = sshll.u32 %s2395_s25, 4  ;;  %s2249_s11 = int_to_ptr.vmem [resolvable:$false] %s2248_s11 }
 0x101   : > { %s2250_s29 = scalar_lea.vmem %s2249_s11, 256  ;;  %p2251_p6 = scmp.lt.s32.totalorder %s2759_s2, %s2249_s11 }
 0x102   : > { %p2246_p5 = pnand %p2244_p3, %p2230_p8  ;;  %p2252_p9 = scmp.lt.s32.totalorder %s2250_s29, %s2243_s16 }
 0x104   : > { %p2247_p2 = pneg %p2246_p5  ;;  %p2253_p4 = por %p2252_p9, %p2251_p6 }
 0x106   : > { %p2254_p10 = pnand %p2253_p4, %p2247_p2 }
 0x108   : > { %2257 = shalt.err (!%p2254_p10)
}
 0x109   : > { %1863 = dma.hbm_to_vmem [thread:$0]  (!%p2755_p1), %s2753_s13, 128, %s2759_s2, %s426_s21  }
 0x10a   : > { %s1616_s0 = sshll.u32 %s2382_s20, 4  ;;  %s3052_s25 = sld [smem:[#allocation36_spill]] }
 0x10b   : > { %s446_s16 = scalar_lea.vmem [#allocation9], %s2742_s28  ;;  %s3053_s29 = sand.u32 1, %s2382_s20  }
 0x10c   : > { %s453_s11 = sshll.u32 %s446_s16, 4  ;;  %s444_s3 = scalar_lea.sflag [#allocation10], %s3053_s29  ;;  %s454_s11 = int_to_ptr.vmem [resolvable:$true] %s453_s11 }
 0x110   : > { %s2792_s1 = scalar_lea.hbm %s3052_s25, %s1616_s0  ;;  %s2263_s21 = scalar_lea.hbm %s3052_s25, 32 }
 0x111   : > { %s2258_s4 = scalar_lea.hbm %s2792_s1, 16  ;;  %p2264_p11 = scmp.lt.u32.totalorder %s2792_s1, %s3052_s25 }
 0x112   : > { %p2259_p6 = scmp.ne.s32.totalorder %s2792_s1, %s2258_s4  ;;  %p2265_p13 = scmp.lt.u32.totalorder %s2263_s21, %s2258_s4 }
 0x113   : > { %p2267_p3 = scmp.lt.u32.totalorder %s2258_s4, %s2792_s1 }
 0x114   : > { %p2261_p2 = pnand %p2259_p6, %p2230_p8  ;;  %p2266_p0 = por %p2265_p13, %p2264_p11 }
 0x116   : > { %p2262_p7 = pneg %p2261_p2  ;;  %p2268_p5 = por %p2267_p3, %p2266_p0 }
 0x118   : > { %p2269_p9 = pnand %p2268_p5, %p2262_p7 }
 0x11a   : > { %2272 = shalt.err (!%p2269_p9)
}
 0x11b   : > { %s2273_s28 = scalar_lea.vmem %s454_s11, 16  ;;  %s2396_s12 = smov [#allocation9]  }
 0x11c   : > { %p2274_p4 = scmp.ne.s32.totalorder %s454_s11, %s2273_s28  ;;  %s2278_s16 = sshll.u32 %s2396_s12, 4  ;;  %s2279_s16 = int_to_ptr.vmem [resolvable:$false] %s2278_s16 }
 0x11d   : > { %s2280_s29 = scalar_lea.vmem %s2279_s16, 32  ;;  %p2281_p2 = scmp.lt.s32.totalorder %s454_s11, %s2279_s16 }
 0x11e   : > { %p2276_p10 = pnand %p2274_p4, %p2230_p8  ;;  %p2282_p12 = scmp.lt.s32.totalorder %s2280_s29, %s2273_s28 }
 0x120   : > { %p2277_p6 = pneg %p2276_p10  ;;  %p2283_p11 = por %p2282_p12, %p2281_p2 }
 0x122   : > { %p2284_p13 = pnand %p2283_p11, %p2277_p6 }
 0x124   : > { %2287 = shalt.err (!%p2284_p13)
}
 0x125   : > { %1866 = dma.hbm_to_vmem [thread:$0]  (!%p2755_p1), %s2792_s1, 16, %s454_s11, %s444_s3  }
 0x126   : > { %s3054_s4 = sld [smem:[#allocation33_spill]] }
 0x12c   : > { %p3055_p7 = scmp.ne.s32.totalorder %s3054_s4, 0 }
 0x12d   : > { %p3056_p0 = scmp.eq.s32.totalorder (!%p3055_p7), %s2495_s23, 0 }
 0x12e   : > { %462 = sbr.rel (%p3055_p7) target bundleno = 2935 (0xb77), region = 64 }
 0x135   : > { %2333 = dma.done.wait (%p3056_p0), [#allocation7], 32   ;;  %p3057_p8 = pmov %p3056_p0 }
 0x136   : > { %s2823_s13 = sand.u32 1, %s2374_s18   ;;  %p3058_p12 = scmp.ne.s32.totalorder %s3047_s22, 0 }
 0x137   : > { %2335 = vsyncadd (%p3057_p8), [#allocation7], 4294967264  ;;  %s1619_s2 = sshll.u32 %s2823_s13, 3  ;;  %s469_s15 = scalar_lea.sflag [#allocation5], %s2823_s13 }
 0x138   : > { %s472_s1 = scalar_lea.vmem [#allocation8], %s1619_s2 }
 0x139   : > { %2337 = dma.done.wait (%p3058_p12), %s469_s15, 128  }
 0x13a   : > { %2339 = vsyncadd (%p3058_p12), %s469_s15, 4294967168  ;;  %s477_s3 = sand.u32 1, %s2495_s23   ;;  %s480_s21 = scalar_lea.vmem [#allocation9], %s2823_s13 }
 0x13b   : > { %s478_s11 = scalar_lea.sflag [#allocation10], %s477_s3 }
 0x13c   : > { %2341 = dma.done.wait (%p3058_p12), %s478_s11, 16  }
 0x13d   : > { %2343 = vsyncadd (%p3058_p12), %s478_s11, 4294967280  ;;  %p3059_p1 = pmov %p3056_p0 }
 0x13e   : > { %p3060_p3 = pmov %p3056_p0 }
 0x13f   : > { %2345 = dma.done.wait (%p3059_p1), [#allocation10], 256  }
 0x140   : > { %2347 = vsyncadd (%p3060_p3), [#allocation10], 4294967040  ;;  %p3061_p5 = pmov %p3056_p0 }
 0x141   : > { %p3062_p9 = pmov %p3056_p0 }
 0x142   : > { %2349 = dma.done.wait (%p3061_p5), [#allocation13], 272  }
 0x143   : > { %2351 = vsyncadd (%p3062_p9), [#allocation13], 4294967024  ;;  %p3063_p4 = pmov %p3056_p0 }
 0x144   : > { %p3064_p10 = pmov %p3056_p0 }
 0x145   : > { %2353 = dma.done.wait (%p3063_p4), [#allocation16], 272  }
 0x146   : > { %2355 = vsyncadd (%p3064_p10), [#allocation16], 4294967024  ;;  %p3065_p6 = pmov %p3056_p0 }
 0x147   : > { %p3066_p2 = pmov %p3056_p0 }
 0x148   : > { %2357 = dma.done.wait (%p3065_p6), [#allocation19], 528  }
 0x149   : > { %2359 = vsyncadd (%p3066_p2), [#allocation19], 4294966768  ;;  %p3067_p11 = pmov %p3056_p0 }
 0x14a   : > { %p3068_p13 = pmov %p3056_p0 }
 0x14b   : > { %2361 = dma.done.wait (%p3067_p11), [#allocation22], 16  }
 0x14c   : > { %2363 = vsyncadd (%p3068_p13), [#allocation22], 4294967280 }
 0x14d   : > { %517 = sfence }
 0x14e   : > { %v2859_v0 = vld [vmem:[%s472_s1] sm:$0xff]  ;;  %vm560_vm0 = vcmask 261120   ;;  %v1950_v7 = vld [vmem:[#allocation11] sm:$0xff]   ;;  %v2397_v8 = vmov 0.0   ;;  %vm2398_vm1 = vmmov 0   ;;  %s558_s22 = sld [smem:[#allocation4]] }
 0x14f   : > { %v561_v1 = vsel %vm560_vm0, %v2859_v0, 0.0  ;;  %1706 = vmatprep.subr.bf16.mxu0 %v2397_v8  ;;  %1710 = vmatprep.mubr.msk.bf16.mxu0 %vm2398_vm1, %v2397_v8  ;;  %v1951_v9 = vld [vmem:[#allocation11 + $0x8] sm:$0xff]   ;;  %s1629_s0 = sld [smem:[#allocation4 + $0x1]]  ;;  %v1630_v25 = vld [vmem:[#allocation12] ss:$0 sm:$0xff]  ;;  %vm654_vm4 = vcmask 781312  }
 0x150   : > { %562 = vadd.xlane.f32.xlu0 %v561_v1  ;;  %1707 = vmatpush3.bf16.msra.mxu0 %v1950_v7  ;;  %s2399_s14 = smov 120   ;;  %s2400_s28 = smov 96   ;;  %vm670_vm5 = vcmask 64512   ;;  %v1634_v51 = vld [vmem:[%s480_s21] ss:$0 sm:$0xff]  ;;  %vm734_vm6 = vcmask 1043456  }
 0x151   : > { %1714 = vmatprep.subr.bf16.mxu1 %v2397_v8  ;;  %1708 = vmatprep.subr.bf16.mxu0 %v2397_v8  ;;  %s2401_s12 = smov 88   ;;  %s2402_s16 = smov 80   ;;  %vm779_vm7 = vcmask 60416   ;;  %vm906_vm8 = vcmask 126016   ;;  %vm1033_vm9 = vcmask 191616   ;;  %vm1160_vm10 = vcmask 257216  }
 0x152   : > { %1716 = vmatprep.mubr.msk.bf16.mxu1 %vm2398_vm1, %v2397_v8  ;;  %s2403_s29 = smov 112   ;;  %s2404_s4 = smov 72   ;;  %vm1364_vm13 = vcmask 523264  }
 0x153   : > { %s2405_s15 = smov 104   ;;  %s2406_s1 = smov 64  }
 0x154   : > { %1709 = vmatpush3.bf16.msra.mxu0 %v1951_v9  ;;  %v581_v18 = vstv %s558_s22  ;;  %s2407_s3 = smov 56   ;;  %s2408_s11 = smov 48  }
 0x155   : > { %1720 = vmatprep.subr.bf16.mxu0 %v2397_v8  ;;  %v584_v21 = vstv %s1629_s0  ;;  %s2409_s21 = smov 40   ;;  %s2410_s22 = smov 8  }
 0x156   : > { %s2411_s0 = smov 16   ;;  %p3070_p0 = scmp.ne.s32.totalorder %s3048_s24, 0 }
 0x1dd   : > { %v563_v2 = vpop.xlane.xlu0 %562 }
 0x1de   : > { %v565_v3 = vmul.f32 0.03125, %v563_v2 }
 0x1e0   : > { %v566_v4 = vsub.f32 %v2859_v0, %v565_v3 }
 0x1e2   : > { %v567_v5 = vmul.f32 %v566_v4, %v566_v4 }
 0x1e4   : > { %v568_v6 = vsel %vm560_vm0, %v567_v5, 0.0 }
 0x1e5   : > { %569 = vadd.xlane.f32.xlu0 %v568_v6 }
 0x272   : > { %v570_v10 = vpop.xlane.xlu0 %569 }
 0x273   : > { %v571_v11 = vmul.f32 0.032258064, %v570_v10 }
 0x275   : > { %1967 = vrsqrt.f32 %v571_v11  ;;  %vm574_vm2 = vcmp.eq.f32.partialorder %v571_v11, inf  ;;  %v577_v14 = vand.u32 2147483648, %v571_v11  ;;  %vm576_vm3 = vcmp.eq.f32.partialorder %v571_v11, 0.0 }
 0x27f   : > { %v1968_v12 = vpop.eup %1967 }
 0x280   : > { %v573_v13 = vmul.f32 %v1968_v12, %v571_v11 }
 0x282   : > { %v575_v15 = vsel %vm574_vm2, %v571_v11, %v573_v13 }
 0x283   : > { %v578_v16 = vsel %vm576_vm3, %v577_v14, %v575_v15 }
 0x284   : > { %v579_v17 = vadd.f32 1e-06, %v578_v16 }
 0x286   : > { %1969 = vrcp.f32 %v579_v17 }
 0x290   : > { %v1970_v19 = vpop.eup %1969 }
 0x291   : > { %v582_v20 = vmul.f32 %v1970_v19, %v581_v18 }
 0x293   : > { %v583_v22 = vmul.f32 %v582_v20, %v566_v4 }
 0x295   : > { %v585_v23 = vadd.f32 %v584_v21, %v583_v22 }
 0x297   : > { %v586_v24 = vpack.c.bf16 %v585_v23, %v585_v23 }
 0x299   : > { %1711 = vmatmul.mubr.msk.bf16.vlgmr.msra.gmra.mrb[0].mxu0 %vm560_vm0, %v586_v24 }
 0x29a   : > { %1722 = vmatprep.mubr.msk.bf16.mxu0 %vm2398_vm1, %v2397_v8 }
 0x36c   : > { %v647_v26 = vpop.f32.mrb[0].mxu0 }
 0x36d   : > { %v648_v27 = vadd.f32 %v1630_v25, %v647_v26  ;;  %v1712_v28 = vpop.f32.mrb[1].mxu0 }
 0x36e   : > { %v650_v29 = vpop.f32.mrb[2].mxu0 }
 0x36f   : > { %v653_v30 = vpack.c.bf16 %v648_v27, %v648_v27  ;;  %v1713_v31 = vpop.f32.mrb[3].mxu0 }
 0x371   : > { %655 = vst.msk [vmem:[#allocation2] sm:$0xf] %vm654_vm4, %v653_v30 }
 0x378   : > { %v1952_v32 = vld [vmem:[#allocation2] ss:$0 sps:$4 sm:$0xff]  }
 0x379   : > { %v2876_v33 = vld [vmem:[#allocation2] ss:$0 sps:$4 sm:$0xff]   ;;  %786 = vrot.lane.b32.xlu0 %v1952_v32, %s2399_s14  ;;  %s2412_s14 = smov 24  }
 0x37a   : > { %668 = vrot.lane.b32.xlu1 %v2876_v33, %s2400_s28  ;;  %v2879_v34 = vld [vmem:[#allocation2] ss:$0 sps:$4 sm:$0xff]   ;;  %s1657_s28 = sld [smem:[#allocation4 + $0x80]] }
 0x37b   : > { %v2882_v35 = vld [vmem:[#allocation2] ss:$0 sps:$4 sm:$0xff]  }
 0x37c   : > { %v1956_v36 = vld [vmem:[#allocation2] ss:$0 sps:$4 sm:$0xff]  }
 0x37d   : > { %v2885_v37 = vld [vmem:[#allocation2] ss:$0 sps:$4 sm:$0xff]  }
 0x37e   : > { %791 = vrot.lane.b32.xlu1 %v2879_v34, %s2401_s12  ;;  %v1958_v38 = vld [vmem:[#allocation2] ss:$0 sps:$4 sm:$0xff]   ;;  %s1658_s12 = sld [smem:[#allocation4 + $0x81]] }
 0x37f   : > { %v658_v42 = vld [vmem:[#allocation2] sm:$0xf] }
 0x382   : > { %918 = vrot.lane.b32.xlu1 %v2882_v35, %s2402_s16  ;;  %s1670_s16 = sshll.u32 %s2495_s23, 7  ;;  %s1411_s23 = scalar_lea.sflag [#allocation6], %s2823_s13 }
 0x386   : > { %913 = vrot.lane.b32.xlu1 %v1956_v36, %s2403_s29  ;;  %s555_s29 = scalar_lea.vmem [#allocation23], %s1619_s2 }
 0x38a   : > { %1045 = vrot.lane.b32.xlu1 %v2885_v37, %s2404_s4  ;;  %s1424_s4 = sshll.u32 %s555_s29, 4  ;;  %s2968_s4 = int_to_ptr.vmem [resolvable:$true] %s1424_s4 }
 0x38b   : > { %s2288_s2 = scalar_lea.vmem %s2968_s4, 128 }
 0x38c   : > { %p2289_p7 = scmp.ne.s32.totalorder %s2968_s4, %s2288_s2 }
 0x38e   : > { %1040 = vrot.lane.b32.xlu1 %v1958_v38, %s2405_s15  ;;  %p2290_p8 = pnand %p2289_p7, %p3070_p0 }
 0x390   : > { %p2291_p12 = pneg %p2290_p8 }
 0x3eb   : > { %v787_v45 = vpop.permute.xlu0 %786 }
 0x3ec   : > { %v669_v39 = vpop.permute.xlu1 %668 }
 0x3ed   : > { %v675_v40 = vsel %vm670_vm5, %v669_v39, 0 }
 0x3ee   : > { %1715 = vmatpush3.bf16.xpose.msra.mxu1 %v675_v40 }
 0x3ef   : > { %1726 = vmatprep.subr.bf16.mxu1 %v2397_v8 }
 0x3f0   : > { %v792_v41 = vpop.permute.xlu1 %791 }
 0x3f1   : > { %v797_v43 = vsel %vm670_vm5, %v792_v41, 0 }
 0x3f4   : > { %v919_v44 = vpop.permute.xlu1 %918 }
 0x3f5   : > { %1717 = vmatmul.mubr.msk.bf16.vlgmr.msra.gmra.mrb[0].mxu1 %vm670_vm5, %v658_v42  ;;  %v924_v47 = vsel %vm670_vm5, %v919_v44, 0 }
 0x3f6   : > { %1727 = vmatpush3.bf16.xpose.msra.mxu1 %v797_v43  ;;  %1728 = vmatprep.mubr.msk.bf16.mxu1 %vm2398_vm1, %v2397_v8 }
 0x3f7   : > { %1738 = vmatprep.subr.bf16.mxu1 %v2397_v8 }
 0x3f8   : > { %v914_v46 = vpop.permute.xlu1 %913 }
 0x3fc   : > { %v1046_v48 = vpop.permute.xlu1 %1045 }
 0x3fd   : > { %1729 = vmatmul.mubr.msk.bf16.vlgmr.msra.gmra.mrb[4].mxu1 %vm670_vm5, %v787_v45  ;;  %v1051_v49 = vsel %vm670_vm5, %v1046_v48, 0 }
 0x3fe   : > { %1739 = vmatpush3.bf16.xpose.msra.mxu1 %v924_v47  ;;  %1740 = vmatprep.mubr.msk.bf16.mxu1 %vm2398_vm1, %v2397_v8 }
 0x3ff   : > { %1750 = vmatprep.subr.bf16.mxu1 %v2397_v8 }
 0x400   : > { %v1041_v50 = vpop.permute.xlu1 %1040 }
 0x405   : > { %1741 = vmatmul.mubr.msk.bf16.vlgmr.msra.gmra.mrb[8].mxu1 %vm670_vm5, %v914_v46 }
 0x406   : > { %1751 = vmatpush3.bf16.xpose.msra.mxu1 %v1051_v49  ;;  %1752 = vmatprep.mubr.msk.bf16.mxu1 %vm2398_vm1, %v2397_v8 }
 0x407   : > { %1762 = vmatprep.subr.bf16.mxu1 %v2397_v8 }
 0x40d   : > { %1753 = vmatmul.mubr.msk.bf16.vlgmr.msra.gmra.mrb[12].mxu1 %vm670_vm5, %v1041_v50 }
 0x40e   : > { %1766 = vmatprep.mubr.msk.bf16.mxu1 %vm2398_vm1, %v2397_v8 }
 0x4c8   : > { %v711_v52 = vpop.f32.mrb[0].mxu1 }
 0x4c9   : > { %v712_v53 = vadd.f32 %v1634_v51, %v711_v52  ;;  %v1718_v54 = vpop.f32.mrb[1].mxu1 }
 0x4ca   : > { %v714_v55 = vpop.f32.mrb[2].mxu1 }
 0x4cb   : > { %v1719_v56 = vpop.f32.mrb[3].mxu1  ;;  %v717_v57 = vsel %vm670_vm5, %v712_v53, -inf }
 0x4cc   : > { %718 = vmax.xlane.f32.xlu1 %v717_v57 }
 0x4d0   : > { %v833_v58 = vpop.f32.mrb[4].mxu1 }
 0x4d1   : > { %v834_v59 = vadd.f32 %v1634_v51, %v833_v58  ;;  %v1730_v60 = vpop.f32.mrb[5].mxu1 }
 0x4d2   : > { %v836_v61 = vpop.f32.mrb[6].mxu1 }
 0x4d3   : > { %v1731_v62 = vpop.f32.mrb[7].mxu1  ;;  %v839_v63 = vsel %vm670_vm5, %v834_v59, -inf }
 0x4d4   : > { %840 = vmax.xlane.f32.xlu0 %v839_v63 }
 0x4d8   : > { %v960_v1 = vpop.f32.mrb[8].mxu1 }
 0x4d9   : > { %v961_v2 = vadd.f32 %v1634_v51, %v960_v1  ;;  %v1742_v3 = vpop.f32.mrb[9].mxu1 }
 0x4da   : > { %v963_v4 = vpop.f32.mrb[10].mxu1 }
 0x4db   : > { %v1743_v5 = vpop.f32.mrb[11].mxu1  ;;  %v966_v6 = vsel %vm670_vm5, %v961_v2, -inf }
 0x4dc   : > { %967 = vmax.xlane.f32.xlu1 %v966_v6  ;;  %v1959_v5 = vld [vmem:[#allocation14] sm:$0xff]  }
 0x4dd   : > { %1763 = vmatpush3.bf16.msra.mxu1 %v1959_v5 }
 0x4de   : > { %1764 = vmatprep.subr.bf16.mxu1 %v2397_v8 }
 0x4e0   : > { %v1087_v7 = vpop.f32.mrb[12].mxu1 }
 0x4e1   : > { %v1088_v9 = vadd.f32 %v1634_v51, %v1087_v7  ;;  %v1754_v10 = vpop.f32.mrb[13].mxu1  ;;  %v1960_v7 = vld [vmem:[#allocation14 + $0x8] sm:$0xff]  }
 0x4e2   : > { %v1090_v11 = vpop.f32.mrb[14].mxu1  ;;  %1765 = vmatpush3.bf16.msra.mxu1 %v1960_v7 }
 0x4e3   : > { %v1755_v12 = vpop.f32.mrb[15].mxu1  ;;  %v1093_v13 = vsel %vm670_vm5, %v1088_v9, -inf  ;;  %1778 = vmatprep.subr.bf16.mxu1 %v2397_v8 }
 0x4e4   : > { %1094 = vmax.xlane.f32.xlu0 %v1093_v13 }
 0x559   : > { %v719_v14 = vpop.xlane.xlu1 %718 }
 0x55a   : > { %v720_v15 = vsub.f32 %v712_v53, %v719_v14 }
 0x55c   : > { %v721_v16 = vmul.f32 1.442695, %v720_v15 }
 0x55e   : > { %1971 = vpow2.f32 %v721_v16 }
 0x561   : > { %v841_v17 = vpop.xlane.xlu0 %840 }
 0x562   : > { %v842_v18 = vsub.f32 %v834_v59, %v841_v17 }
 0x564   : > { %v843_v19 = vmul.f32 1.442695, %v842_v18 }
 0x566   : > { %1973 = vpow2.f32 %v843_v19 }
 0x568   : > { %v1972_v20 = vpop.eup %1971 }
 0x569   : > { %v723_v21 = vsel %vm670_vm5, %v1972_v20, 0.0  ;;  %v968_v29 = vpop.xlane.xlu1 %967 }
 0x56a   : > { %724 = vadd.xlane.f32.xlu1 %v723_v21  ;;  %v969_v30 = vsub.f32 %v961_v2, %v968_v29 }
 0x56c   : > { %v970_v31 = vmul.f32 1.442695, %v969_v30 }
 0x570   : > { %v1974_v22 = vpop.eup %1973 }
 0x571   : > { %v1095_v23 = vpop.xlane.xlu0 %1094  ;;  %v845_v24 = vsel %vm670_vm5, %v1974_v22, 0.0 }
 0x572   : > { %v1096_v25 = vsub.f32 %v1088_v9, %v1095_v23  ;;  %846 = vadd.xlane.f32.xlu0 %v845_v24 }
 0x574   : > { %v1097_v26 = vmul.f32 1.442695, %v1096_v25 }
 0x576   : > { %1975 = vpow2.f32 %v1097_v26 }
 0x577   : > { %1977 = vpow2.f32 %v970_v31 }
 0x57b   : > { %729 = vrot.lane.b32.xlu1 %v2876_v33, %s2406_s1 }
 0x580   : > { %v1976_v27 = vpop.eup %1975 }
 0x581   : > { %v1099_v28 = vsel %vm670_vm5, %v1976_v27, 0.0  ;;  %v1978_v32 = vpop.eup %1977 }
 0x582   : > { %1100 = vadd.xlane.f32.xlu0 %v1099_v28  ;;  %v972_v36 = vsel %vm670_vm5, %v1978_v32, 0.0 }
 0x598   : > { %851 = vrot.lane.b32.xlu0 %v2879_v34, %s2407_s3  ;;  %s3069_s3 = sld [smem:[#allocation39_spill]] }
 0x59f   : > { %973 = vadd.xlane.f32.xlu1 %v972_v36 }
 0x5b0   : > { %978 = vrot.lane.b32.xlu1 %v2882_v35, %s2408_s11  ;;  %s2966_s11 = scalar_lea.hbm %s3069_s3, %s1670_s16 }
 0x5b4   : > { %1105 = vrot.lane.b32.xlu1 %v2885_v37, %s2409_s21  ;;  %s2413_s21 = smov [#allocation23]  }
 0x5f7   : > { %v725_v33 = vpop.xlane.xlu1 %724 }
 0x5f8   : > { %1979 = vrcp.f32 %v725_v33 }
 0x5fb   : > { %v730_v38 = vpop.permute.xlu1 %729 }
 0x5fc   : > { %v736_v39 = vsel %vm734_vm6, %v730_v38, 0  ;;  %v1961_v38 = vld [vmem:[#allocation17] sm:$0xff]  }
 0x5fd   : > { %1721 = vmatpush3.bf16.msra.mxu0 %v736_v39  ;;  %v1962_v39 = vld [vmem:[#allocation17 + $0x8] sm:$0xff]  }
 0x5fe   : > { %1732 = vmatprep.subr.bf16.mxu0 %v2397_v8 }
 0x5ff   : > { %v847_v40 = vpop.xlane.xlu0 %846 }
 0x600   : > { %1981 = vrcp.f32 %v847_v40 }
 0x602   : > { %v1980_v34 = vpop.eup %1979 }
 0x603   : > { %v727_v41 = vmul.f32 %v1980_v34, %v1972_v20  ;;  %v1964_v34 = vld [vmem:[#allocation20 + $0x8] sm:$0xff]  }
 0x605   : > { %v728_v42 = vpack.c.bf16 %v727_v41, %v727_v41 }
 0x607   : > { %1723 = vmatmul.mubr.msk.bf16.vlgmr.msra.gmra.mrb[4].mxu0 %vm670_vm5, %v728_v42 }
 0x608   : > { %1734 = vmatprep.mubr.msk.bf16.mxu0 %vm2398_vm1, %v2397_v8 }
 0x60a   : > { %v1982_v35 = vpop.eup %1981 }
 0x60b   : > { %v849_v43 = vmul.f32 %v1982_v35, %v1974_v22  ;;  %v1653_v22 = vld [vmem:[#allocation15] ss:$0 sm:$0xff] }
 0x60d   : > { %v850_v46 = vpack.c.bf16 %v849_v43, %v849_v43 }
 0x60f   : > { %v1101_v37 = vpop.xlane.xlu0 %1100 }
 0x613   : > { %v852_v44 = vpop.permute.xlu0 %851 }
 0x614   : > { %v857_v45 = vsel %vm734_vm6, %v852_v44, 0 }
 0x615   : > { %1733 = vmatpush3.bf16.msra.mxu0 %v857_v45 }
 0x616   : > { %1744 = vmatprep.subr.bf16.mxu0 %v2397_v8 }
 0x618   : > { %1735 = vmatmul.mubr.msk.bf16.vlgmr.msra.gmra.mrb[8].mxu0 %vm670_vm5, %v850_v46  ;;  %v1251_v46 = vstv %s1657_s28 }
 0x619   : > { %1746 = vmatprep.mubr.msk.bf16.mxu0 %vm2398_vm1, %v2397_v8 }
 0x62c   : > { %v974_v47 = vpop.xlane.xlu1 %973 }
 0x62d   : > { %1983 = vrcp.f32 %v974_v47 }
 0x62e   : > { %1985 = vrcp.f32 %v1101_v37 }
 0x630   : > { %v979_v48 = vpop.permute.xlu1 %978 }
 0x631   : > { %v984_v49 = vsel %vm734_vm6, %v979_v48, 0 }
 0x632   : > { %1745 = vmatpush3.bf16.msra.mxu0 %v984_v49  ;;  %v1254_v49 = vstv %s1658_s12 }
 0x633   : > { %1756 = vmatprep.subr.bf16.mxu0 %v2397_v8 }
 0x634   : > { %v1106_v52 = vpop.permute.xlu1 %1105 }
 0x635   : > { %v1111_v55 = vsel %vm734_vm6, %v1106_v52, 0 }
 0x637   : > { %v1984_v50 = vpop.eup %1983 }
 0x638   : > { %v976_v51 = vmul.f32 %v1984_v50, %v1978_v32  ;;  %v1986_v54 = vpop.eup %1985 }
 0x639   : > { %v1103_v56 = vmul.f32 %v1986_v54, %v1976_v27  ;;  %v1966_v54 = vld [vmem:[#allocation20 + $0x18] sm:$0xff]  }
 0x63a   : > { %v977_v53 = vpack.c.bf16 %v976_v51, %v976_v51 }
 0x63b   : > { %v1104_v57 = vpack.c.bf16 %v1103_v56, %v1103_v56 }
 0x63c   : > { %1747 = vmatmul.mubr.msk.bf16.vlgmr.msra.gmra.mrb[12].mxu0 %vm670_vm5, %v977_v53  ;;  %v1965_v53 = vld [vmem:[#allocation20 + $0x10] sm:$0xff]  }
 0x63d   : > { %1757 = vmatpush3.bf16.msra.mxu0 %v1111_v55  ;;  %1758 = vmatprep.mubr.msk.bf16.mxu0 %vm2398_vm1, %v2397_v8  ;;  %v1659_v55 = vld [vmem:[#allocation18] ss:$0 sm:$0xff] }
 0x63e   : > { %1770 = vmatprep.subr.bf16.mxu0 %v2397_v8 }
 0x644   : > { %1759 = vmatmul.mubr.msk.bf16.vlgmr.msra.gmra.mrb[16].mxu0 %vm670_vm5, %v1104_v57 }
 0x645   : > { %1774 = vmatprep.mubr.msk.bf16.mxu0 %vm2398_vm1, %v2397_v8  ;;  %1771 = vmatpush3.bf16.msra.mxu0 %v1961_v38 }
 0x646   : > { %1772 = vmatprep.subr.bf16.mxu0 %v2397_v8 }
 0x649   : > { %1773 = vmatpush3.bf16.msra.mxu0 %v1962_v39 }
 0x6da   : > { %v772_v58 = vpop.f32.mrb[4].mxu0 }
 0x6db   : > { %v778_v59 = vpack.c.bf16 %v772_v58, %v772_v58  ;;  %v1724_v60 = vpop.f32.mrb[5].mxu0 }
 0x6dc   : > { %v775_v61 = vpop.f32.mrb[6].mxu0 }
 0x6dd   : > { %780 = vst.msk [vmem:[#allocation3] sm:$0xf] %vm779_vm7, %v778_v59  ;;  %v1725_v62 = vpop.f32.mrb[7].mxu0 }
 0x6eb   : > { %v893_v63 = vpop.f32.mrb[8].mxu0 }
 0x6ec   : > { %v1673_v1 = vpack.c.bf16 %v893_v63, %v893_v63  ;;  %v1736_v2 = vpop.f32.mrb[9].mxu0  ;;  %v1663_v63 = vld [vmem:[#allocation21] ss:$0 sm:$0xff] }
 0x6ed   : > { %v896_v3 = vpop.f32.mrb[10].mxu0 }
 0x6ee   : > { %903 = vrot.lane.b32.xlu0 %v1673_v1, %s2410_s22  ;;  %v1737_v4 = vpop.f32.mrb[11].mxu0  ;;  %s2292_s22 = sshll.u32 %s2413_s21, 4  ;;  %s2293_s22 = int_to_ptr.vmem [resolvable:$false] %s2292_s22 }
 0x6ef   : > { %p2295_p1 = scmp.lt.s32.totalorder %s2968_s4, %s2293_s22 }
 0x70f   : > { %v1020_v6 = vpop.f32.mrb[12].mxu0 }
 0x710   : > { %v1674_v9 = vpack.c.bf16 %v1020_v6, %v1020_v6  ;;  %v1748_v10 = vpop.f32.mrb[13].mxu0 }
 0x711   : > { %v1023_v11 = vpop.f32.mrb[14].mxu0 }
 0x712   : > { %1030 = vrot.lane.b32.xlu1 %v1674_v9, %s2411_s0  ;;  %v1749_v12 = vpop.f32.mrb[15].mxu0  ;;  %s2294_s0 = scalar_lea.vmem %s2293_s22, 256 }
 0x713   : > { %p2296_p3 = scmp.lt.s32.totalorder %s2294_s0, %s2288_s2 }
 0x715   : > { %p2297_p5 = por %p2296_p3, %p2295_p1 }
 0x717   : > { %v1147_v13 = vpop.f32.mrb[16].mxu0  ;;  %p2298_p9 = pnand %p2297_p5, %p2291_p12 }
 0x718   : > { %v1675_v14 = vpack.c.bf16 %v1147_v13, %v1147_v13  ;;  %v1760_v15 = vpop.f32.mrb[17].mxu0 }
 0x719   : > { %v1150_v16 = vpop.f32.mrb[18].mxu0 }
 0x71a   : > { %1157 = vrot.lane.b32.xlu0 %v1675_v14, %s2412_s14  ;;  %v1761_v17 = vpop.f32.mrb[19].mxu0 }
 0x760   : > { %v904_v18 = vpop.permute.xlu0 %903 }
 0x761   : > { %907 = vst.msk [vmem:[#allocation3] sm:$0xf] %vm906_vm8, %v904_v18 }
 0x784   : > { %v1031_v19 = vpop.permute.xlu1 %1030 }
 0x785   : > { %1034 = vst.msk [vmem:[#allocation3] sm:$0xf] %vm1033_vm9, %v1031_v19 }
 0x78c   : > { %v1158_v20 = vpop.permute.xlu0 %1157 }
 0x78d   : > { %1161 = vst.msk [vmem:[#allocation3] sm:$0xf] %vm1160_vm10, %v1158_v20 }
 0x794   : > { %v1162_v21 = vld [vmem:[#allocation3] sm:$0xf] }
 0x795   : > { %1767 = vmatmul.mubr.msk.bf16.vlgmr.msra.gmra.mrb[16].mxu1 %vm560_vm0, %v1162_v21 }
 0x796   : > { %1786 = vmatprep.mubr.msk.bf16.mxu1 %vm2398_vm1, %v2397_v8 }
 0x868   : > { %v1223_v23 = vpop.f32.mrb[16].mxu1 }
 0x869   : > { %v1224_v24 = vadd.f32 %v1653_v22, %v1223_v23  ;;  %v1768_v25 = vpop.f32.mrb[17].mxu1 }
 0x86a   : > { %v1226_v26 = vpop.f32.mrb[18].mxu1 }
 0x86b   : > { %v2948_v27 = vadd.f32 %v1224_v24, %v2859_v0  ;;  %v1769_v28 = vpop.f32.mrb[19].mxu1  ;;  %v1963_v0 = vld [vmem:[#allocation20] sm:$0xff]  }
 0x86c   : > { %1779 = vmatpush3.bf16.msra.mxu1 %v1963_v0 }
 0x86d   : > { %v1232_v29 = vsel %vm560_vm0, %v2948_v27, 0.0  ;;  %1780 = vmatprep.subr.bf16.mxu1 %v2397_v8 }
 0x86e   : > { %1233 = vadd.xlane.f32.xlu1 %v1232_v29 }
 0x870   : > { %1781 = vmatpush3.bf16.msra.mxu1 %v1964_v34 }
 0x871   : > { %1782 = vmatprep.subr.bf16.mxu1 %v2397_v8 }
 0x874   : > { %1783 = vmatpush3.bf16.msra.mxu1 %v1965_v53 }
 0x875   : > { %1784 = vmatprep.subr.bf16.mxu1 %v2397_v8 }
 0x878   : > { %1785 = vmatpush3.bf16.msra.mxu1 %v1966_v54 }
 0x8fb   : > { %v1234_v30 = vpop.xlane.xlu1 %1233 }
 0x8fc   : > { %v1235_v31 = vmul.f32 0.03125, %v1234_v30 }
 0x8fe   : > { %v1236_v32 = vsub.f32 %v2948_v27, %v1235_v31 }
 0x900   : > { %v1237_v36 = vmul.f32 %v1236_v32, %v1236_v32 }
 0x902   : > { %v1238_v33 = vsel %vm560_vm0, %v1237_v36, 0.0 }
 0x903   : > { %1239 = vadd.xlane.f32.xlu0 %v1238_v33 }
 0x990   : > { %v1240_v40 = vpop.xlane.xlu0 %1239 }
 0x991   : > { %v1241_v41 = vmul.f32 0.032258064, %v1240_v40 }
 0x993   : > { %1987 = vrsqrt.f32 %v1241_v41  ;;  %vm1244_vm11 = vcmp.eq.f32.partialorder %v1241_v41, inf  ;;  %v1247_v37 = vand.u32 2147483648, %v1241_v41  ;;  %vm1246_vm12 = vcmp.eq.f32.partialorder %v1241_v41, 0.0 }
 0x99d   : > { %v1988_v42 = vpop.eup %1987 }
 0x99e   : > { %v1243_v35 = vmul.f32 %v1988_v42, %v1241_v41 }
 0x9a0   : > { %v1245_v43 = vsel %vm1244_vm11, %v1241_v41, %v1243_v35 }
 0x9a1   : > { %v1248_v44 = vsel %vm1246_vm12, %v1247_v37, %v1245_v43 }
 0x9a2   : > { %v1249_v45 = vadd.f32 1e-06, %v1248_v44 }
 0x9a4   : > { %1989 = vrcp.f32 %v1249_v45 }
 0x9ae   : > { %v1990_v47 = vpop.eup %1989 }
 0x9af   : > { %v1252_v48 = vmul.f32 %v1990_v47, %v1251_v46 }
 0x9b1   : > { %v1253_v50 = vmul.f32 %v1252_v48, %v1236_v32 }
 0x9b3   : > { %v1255_v51 = vadd.f32 %v1254_v49, %v1253_v50 }
 0x9b5   : > { %v1256_v52 = vpack.c.bf16 %v1255_v51, %v1255_v51 }
 0x9b7   : > { %1775 = vmatmul.mubr.msk.bf16.vlgmr.msra.gmra.mrb[20].mxu0 %vm560_vm0, %v1256_v52 }
 0xa8a   : > { %v1317_v56 = vpop.f32.mrb[20].mxu0 }
 0xa8b   : > { %v1318_v57 = vadd.f32 %v1659_v55, %v1317_v56  ;;  %v1776_v58 = vpop.f32.mrb[21].mxu0 }
 0xa8c   : > { %v1320_v59 = vpop.f32.mrb[22].mxu0 }
 0xa8d   : > { %v1323_v60 = vmax.f32 %v1318_v57, 0.0  ;;  %v1777_v61 = vpop.f32.mrb[23].mxu0 }
 0xa8f   : > { %v1324_v62 = vpack.c.bf16 %v1323_v60, %v1323_v60 }
 0xa91   : > { %1787 = vmatmul.mubr.msk.bf16.vlgmr.msra.gmra.mrb[20].mxu1 %vm1364_vm13, %v1324_v62 }
 0xb64   : > { %v1402_v1 = vpop.f32.mrb[20].mxu1 }
 0xb65   : > { %v1403_v8 = vadd.f32 %v1663_v63, %v1402_v1  ;;  %v1788_v2 = vpop.f32.mrb[21].mxu1 }
 0xb66   : > { %v1405_v3 = vpop.f32.mrb[22].mxu1 }
 0xb67   : > { %v1408_v4 = vadd.f32 %v1403_v8, %v2948_v27  ;;  %v1789_v5 = vpop.f32.mrb[23].mxu1 }
 0xb69   : > { %1409 = vst.msk [vmem:[%s555_s29] sm:$0xff] %vm560_vm0, %v1408_v4 }
 0xb6a   : > { %2301 = shalt.err (!%p2298_p9)
}
 0xb6b   : > { %s2302_s13 = scalar_lea.hbm %s2966_s11, 128  ;;  %s2306_s12 = scalar_lea.hbm %s3069_s3, 256 }
 0xb6c   : > { %p2303_p4 = scmp.ne.s32.totalorder %s2966_s11, %s2302_s13  ;;  %p2307_p2 = scmp.lt.u32.totalorder %s2966_s11, %s3069_s3 }
 0xb6d   : > { %p2308_p11 = scmp.lt.u32.totalorder %s2306_s12, %s2302_s13  ;;  %p2310_p7 = scmp.lt.u32.totalorder %s2302_s13, %s2966_s11 }
 0xb6e   : > { %p2304_p10 = pnand %p2303_p4, %p3070_p0 }
 0xb6f   : > { %p2309_p13 = por %p2308_p11, %p2307_p2 }
 0xb70   : > { %p2305_p6 = pneg %p2304_p10 }
 0xb71   : > { %p2311_p8 = por %p2310_p7, %p2309_p13 }
 0xb73   : > { %p2312_p12 = pnand %p2311_p8, %p2305_p6 }
 0xb75   : > { %2315 = shalt.err (!%p2312_p12)
}
 0xb76   : > { %1830 = dma.vmem_to_hbm [thread:$0]  (%p3070_p0), %s2968_s4, 128, %s2966_s11, %s1411_s23  }
 0xb77 PF: > { %s1436_s15 = sand.u32 1, %s2370_s17   ;;  %p3071_p1 = scmp.ne.s32.totalorder %s3049_s26, 0 }
 0xb78   : > { %p3072_p3 = scmp.ge.s32.totalorder %s2382_s20, 2  ;;  %s1437_s1 = scalar_lea.sflag [#allocation6], %s1436_s15 }
 0xb7a   : > { %p1868_p5 = pnand %p3072_p3, %p3071_p1 }
 0xb7c   : > { %2365 = dma.done.wait (!%p1868_p5), %s1437_s1, 128  }
 0xb7d   : > { %2367 = vsyncadd (!%p1868_p5), %s1437_s1, 4294967168  ;;  %p32_p9 = scmp.ge.s32.totalorder %s2716_s27, 4   ;;  %s3073_s17 = smov %s2374_s18 }
 0xb7e   : > { %s3074_s18 = smov %s2378_s19  ;;  %s3075_s19 = smov %s2728_s30 }
 0xb7f   : > { %s3076_s20 = smov %s2716_s27  ;;  %34 = sbr.rel (!%p32_p9) target bundleno = 19 (0x13), region = 159 }
 0xb86   :  { %1442 = vsyncpa [#allocation5], 1 }
 0xb87   :  { %1444 = vsyncpa [#allocation5 + $0x1], 1 }
 0xb88   :  { %1445 = vsyncpa [#allocation10], 1 }
 0xb89   :  { %1447 = vsyncpa [#allocation10 + $0x1], 1 }
 0xb8a   :  { %1448 = vsyncpa [#allocation13], 1 }
 0xb8b   :  { %1449 = vsyncpa [#allocation16], 1 }
 0xb8c   :  { %1450 = vsyncpa [#allocation19], 1 }
 0xb8d   :  { %1451 = vsyncpa [#allocation22], 1 }
 0xb8e   :  { %1452 = vsyncpa [#allocation6], 1 }
 0xb8f   :  { %1454 = vsyncpa [#allocation6 + $0x1], 1 }
 0xb90   :  { %1455 = vsyncpa [#allocation7], 1 }
 0xb91   :  { %1457 = vsyncpa [#allocation7 + $0x1], 1 }

</bundles_post_ra>
